<compile_context>
chip_gen: v7x
topology: tpu7x:2x2x1
jax: 0.10.0
libtpu: 0.0.40
codegen_flags: <defaults>
</compile_context>

<pallas_src>
import math

import jax
import jax.numpy as jnp
from jax.experimental import pallas as pl
from jax.experimental.pallas import tpu as pltpu


K = 5       # conv5x5 kernel_size
PAD = 1     # conv5x5 padding (module)
XPAD = 2    # wrapper pads the input by 2 per side (pad-2 trick, see below)


# ----------------------------------------------------------------------------
# Fused Pallas kernel
# ----------------------------------------------------------------------------
def basic_block_kernel(x_ref, w1_ref, b1_ref, w2_ref, b2_ref, o_ref, h_ref):
    """Fused conv5x5 -> BN -> ReLU -> conv5x5 -> BN -> crop+residual -> ReLU.

    Per grid step: Bblk batch elements, NCL layout, L on the lane axis.
      x_ref : (Bblk, Cin, L + 4)   bf16  input, zero-padded by 2 each side
      w1_ref: (K, Cout, Cin)       bf16  conv1 weight, BN1 scale folded in
      b1_ref: (Cout, 1)            f32   BN1 shift
      w2_ref: (K, Cout, Cout)      bf16  conv2 weight, BN2 scale folded in
      b2_ref: (Cout, 1)            f32   BN2 shift
      o_ref : (Bblk, Cout, L - 4)  f32
      h_ref : (Cout, L)            bf16  VMEM scratch: conv2-padded hidden act
    """
    Bblk = x_ref.shape[0]
    L1p = h_ref.shape[1]            # = L  (conv1 output L-2, plus 2 pad cols)
    L2 = o_ref.shape[2]             # = L - 4

    # Mask selecting the valid interior of the padded hidden activation
    # (columns 0 and L1p-1 are conv2's zero padding).  Hoisted out of the
    # batch loop; applied as a VPU select fused into one aligned store.
    col = jax.lax.broadcasted_iota(jnp.int32, h_ref.shape, 1)
    interior = (col >= PAD) & (col < L1p - PAD)

    for bi in range(Bblk):                       # static unroll, Bblk <= 2
        xb = x_ref[bi]                           # (Cin, L+4) bf16

        # ---- conv1 + bn1 + relu : K shifted MXU matmuls, f32 accumulation --
        # Evaluated on all L1p columns of the 2-padded input; the two edge
        # columns are throwaway and get zeroed by `interior` below, which
        # yields the conv2-padded activation directly at lane offset 0.
        acc1 = jnp.dot(w1_ref[0], xb[:, 0:L1p],
                       preferred_element_type=jnp.float32)
        for k in range(1, K):
            acc1 = acc1 + jnp.dot(w1_ref[k], xb[:, k:k + L1p],
                                  preferred_element_type=jnp.float32)
        h = jnp.maximum(acc1 + b1_ref[...], 0.0)
        # Single lane-aligned full-width store of the padded activation.
        h_ref[...] = jnp.where(interior, h, 0.0).astype(jnp.bfloat16)

        # ---- conv2 + bn2 ----------------------------------------------------
        acc2 = jnp.dot(w2_ref[0], h_ref[:, 0:L2],
                       preferred_element_type=jnp.float32)
        for k in range(1, K):
            acc2 = acc2 + jnp.dot(w2_ref[k], h_ref[:, k:k + L2],
                                  preferred_element_type=jnp.float32)
        out = acc2 + b2_ref[...]

        # ---- cropped residual add + relu ------------------------------------
        # residual[:, :, 0:-4] == x[:, :, 0:L2] == x_pad2[:, XPAD:XPAD+L2]
        res = xb[:, XPAD:XPAD + L2].astype(jnp.float32)
        o_ref[bi] = jnp.maximum(out + res, 0.0)


# ----------------------------------------------------------------------------
# Parameter prep (done ONCE, outside the jitted forward)
# ----------------------------------------------------------------------------
def prepare_params(params, eps=1e-5):
    """Fold inference-mode BatchNorm into the conv weights, reorder to the
    (K, Cout, Cin) layout the kernel consumes, and pre-cast weights to bf16."""
    def fold(conv_w, bn):
        scale = bn["gamma"] / jnp.sqrt(bn["var"] + eps)          # (Cout,)
        shift = bn["beta"] - bn["mean"] * scale                  # (Cout,)
        w = conv_w * scale[:, None, None]                        # (Cout, Cin, K)
        w = jnp.transpose(w, (2, 0, 1)).astype(jnp.bfloat16)     # (K, Cout, Cin)
        return w, shift.reshape(-1, 1).astype(jnp.float32)

    w1, b1 = fold(params["conv1_w"], params["bn1"])
    w2, b2 = fold(params["conv2_w"], params["bn2"])
    return {"w1": w1, "b1": b1, "w2": w2, "b2": b2}


# ----------------------------------------------------------------------------
# Forward wrapper
# ----------------------------------------------------------------------------
def basic_block_forward(x, prep):
    """x: (B, C, L) float32 NCL.  Returns (B, C, L-4) float32 NCL."""
    B, C, L = x.shape
    Cout = prep["b1"].shape[0]
    L1p = L                     # width of the conv2-padded hidden activation
    L2 = L - 4                  # final output length
    Lp2 = L + 2 * XPAD
    # >= 2 parallel grid steps when B >= 4 so both v7x TCs stay busy, while
    # amortizing the ~0.35 us per-step overhead (2 steps instead of 4 at B=4).
    Bblk = 2 if B % 2 == 0 else 1

    # Pad by 2 and cast to bf16 once: halves the kernel's input HBM traffic
    # and removes all per-tap casts inside the kernel.
    x_pad2 = jnp.pad(x, ((0, 0), (0, 0), (XPAD, XPAD))).astype(jnp.bfloat16)

    w1, b1, w2, b2 = prep["w1"], prep["b1"], prep["w2"], prep["b2"]
    flops = 2 * B * K * Cout * C * (L1p + L2)
    bytes_accessed = (x_pad2.size * 2 + (w1.size + w2.size) * 2
                      + (b1.size + b2.size) * 4 + B * Cout * L2 * 4)

    return pl.pallas_call(
        basic_block_kernel,
        out_shape=jax.ShapeDtypeStruct((B, Cout, L2), jnp.float32),
        grid=(B // Bblk,),
        in_specs=[
            pl.BlockSpec((Bblk, C, Lp2), lambda b: (b, 0, 0)),
            pl.BlockSpec((K, Cout, C), lambda b: (0, 0, 0)),
            pl.BlockSpec((Cout, 1), lambda b: (0, 0)),
            pl.BlockSpec((K, Cout, Cout), lambda b: (0, 0, 0)),
            pl.BlockSpec((Cout, 1), lambda b: (0, 0)),
        ],
        out_specs=pl.BlockSpec((Bblk, Cout, L2), lambda b: (b, 0, 0)),
        scratch_shapes=[pltpu.VMEM((Cout, L1p), jnp.bfloat16)],
        compiler_params=pltpu.CompilerParams(
            dimension_semantics=("parallel",)),
        cost_estimate=pl.CostEstimate(
            flops=flops, transcendentals=0, bytes_accessed=bytes_accessed),
    )(x_pad2, w1, b1, w2, b2)


# ----------------------------------------------------------------------------
# Pure-JAX reference (for correctness check)
# ----------------------------------------------------------------------------
def reference_forward(x, params, eps=1e-5):
    def conv1d(v, w):
        return jax.lax.conv_general_dilated(
            v, w, window_strides=(1,), padding=[(PAD, PAD)],
            dimension_numbers=("NCH", "OIH", "NCH"),
            precision=jax.lax.Precision.HIGHEST)

    def bn(v, p):
        scale = p["gamma"] / jnp.sqrt(p["var"] + eps)
        shift = p["beta"] - p["mean"] * scale
        return v * scale[None, :, None] + shift[None, :, None]

    out = jax.nn.relu(bn(conv1d(x, params["conv1_w"]), params["bn1"]))
    out = bn(conv1d(out, params["conv2_w"]), params["bn2"])
    d = x.shape[2] - out.shape[2]
    return jax.nn.relu(x[:, :, 0:-d] + out)


# ----------------------------------------------------------------------------
if __name__ == "__main__":
    B, C, L = 4, 64, 256      # inplanes5_1 = planes = 64, stride=1, no downsample

    key = jax.random.PRNGKey(0)
    (kx, kw1, kw2, kg1, kb1, km1, kv1, kg2, kb2, km2, kv2) = jax.random.split(key, 11)

    bound = 1.0 / math.sqrt(C * K)
    params = {
        "conv1_w": jax.random.uniform(kw1, (C, C, K), jnp.float32, -bound, bound),
        "conv2_w": jax.random.uniform(kw2, (C, C, K), jnp.float32, -bound, bound),
        "bn1": {
            "gamma": jax.random.uniform(kg1, (C,), jnp.float32, 0.5, 1.5),
            "beta": jax.random.uniform(kb1, (C,), jnp.float32, -0.1, 0.1),
            "mean": jax.random.uniform(km1, (C,), jnp.float32, -0.1, 0.1),
            "var": jax.random.uniform(kv1, (C,), jnp.float32, 0.5, 1.5),
        },
        "bn2": {
            "gamma": jax.random.uniform(kg2, (C,), jnp.float32, 0.5, 1.5),
            "beta": jax.random.uniform(kb2, (C,), jnp.float32, -0.1, 0.1),
            "mean": jax.random.uniform(km2, (C,), jnp.float32, -0.1, 0.1),
            "var": jax.random.uniform(kv2, (C,), jnp.float32, 0.5, 1.5),
        },
    }
    x = jax.random.normal(kx, (B, C, L), jnp.float32)

    prep = prepare_params(params)          # BN fold + layout + bf16, done once
    fwd = jax.jit(basic_block_forward)

    out = jax.block_until_ready(fwd(x, prep))

    assert out.shape == (B, C, L - 4), out.shape
    assert bool(jnp.isfinite(out).all())

    ref = reference_forward(x, params)
    max_err = float(jnp.max(jnp.abs(out - ref)))
    assert max_err < 0.1, f"max abs err vs reference too large: {max_err}"

    print("KERNEL_OK")
</pallas_src>

<mosaic_0001>
module attributes {stable_mosaic.version = 11 : i64} {
  func.func @basic_block_kernel(%arg0: i32, %arg1: memref<2x64x260xbf16, #tpu.memory_space<vmem>>, %arg2: memref<5x64x64xbf16, #tpu.memory_space<vmem>>, %arg3: memref<64x1xf32, #tpu.memory_space<vmem>>, %arg4: memref<5x64x64xbf16, #tpu.memory_space<vmem>>, %arg5: memref<64x1xf32, #tpu.memory_space<vmem>>, %arg6: memref<2x64x252xf32, #tpu.memory_space<vmem>>, %arg7: memref<64x256xbf16, #tpu.memory_space<vmem>>) attributes {dimension_semantics = [#tpu.dimension_semantics<parallel>], iteration_bounds = array<i64: 2>, scalar_prefetch = 0 : i64, scratch_operands = 1 : i64, tpu.core_type = #tpu.core_type<tc>, window_params = [{transform_indices = @transform_0, window_bounds = array<i64: 2, 64, 260>}, {pipeline_mode = #tpu.pipeline_mode<synchronous>, transform_indices = @transform_1, window_bounds = array<i64: 5, 64, 64>}, {pipeline_mode = #tpu.pipeline_mode<synchronous>, transform_indices = @transform_2, window_bounds = array<i64: 64, 1>}, {pipeline_mode = #tpu.pipeline_mode<synchronous>, transform_indices = @transform_3, window_bounds = array<i64: 5, 64, 64>}, {pipeline_mode = #tpu.pipeline_mode<synchronous>, transform_indices = @transform_4, window_bounds = array<i64: 64, 1>}, {transform_indices = @transform_5, window_bounds = array<i64: 2, 64, 252>}]} {
    %0 = tpu.iota {dimensions = array<i32: 1>} : vector<64x256xi32>
    %c1_i32 = arith.constant 1 : i32
    %1 = vector.broadcast %c1_i32 : i32 to vector<64x256xi32>
    %2 = arith.cmpi sge, %0, %1 : vector<64x256xi32>
    %c255_i32 = arith.constant 255 : i32
    %3 = vector.broadcast %c255_i32 : i32 to vector<64x256xi32>
    %4 = arith.cmpi slt, %0, %3 : vector<64x256xi32>
    %5 = arith.andi %2, %4 : vector<64x256xi1>
    %c0 = arith.constant 0 : index
    %c0_0 = arith.constant 0 : index
    %c0_1 = arith.constant 0 : index
    %6 = vector.load %arg1[%c0, %c0_0, %c0_1] : memref<2x64x260xbf16, #tpu.memory_space<vmem>>, vector<1x64x260xbf16>
    %7 = vector.shape_cast %6 : vector<1x64x260xbf16> to vector<64x260xbf16>
    %c0_2 = arith.constant 0 : index
    %c0_3 = arith.constant 0 : index
    %c0_4 = arith.constant 0 : index
    %8 = vector.load %arg2[%c0_2, %c0_3, %c0_4] : memref<5x64x64xbf16, #tpu.memory_space<vmem>>, vector<1x64x64xbf16>
    %9 = vector.shape_cast %8 : vector<1x64x64xbf16> to vector<64x64xbf16>
    %10 = vector.extract_strided_slice %7 {offsets = [0, 0], sizes = [64, 256], strides = [1, 1]} : vector<64x260xbf16> to vector<64x256xbf16>
    %cst = arith.constant dense<0.000000e+00> : vector<64x256xf32>
    %11 = tpu.matmul %9, %10, %cst {dimension_numbers = #tpu.dot_dimension_numbers<[1], [0], [0], [1], [0, 0, 1, 1], [], []>} : vector<64x64xbf16>, vector<64x256xbf16>, vector<64x256xf32> -> vector<64x256xf32>
    %c1 = arith.constant 1 : index
    %c0_5 = arith.constant 0 : index
    %c0_6 = arith.constant 0 : index
    %12 = vector.load %arg2[%c1, %c0_5, %c0_6] : memref<5x64x64xbf16, #tpu.memory_space<vmem>>, vector<1x64x64xbf16>
    %13 = vector.shape_cast %12 : vector<1x64x64xbf16> to vector<64x64xbf16>
    %14 = vector.extract_strided_slice %7 {offsets = [0, 1], sizes = [64, 256], strides = [1, 1]} : vector<64x260xbf16> to vector<64x256xbf16>
    %cst_7 = arith.constant dense<0.000000e+00> : vector<64x256xf32>
    %15 = tpu.matmul %13, %14, %cst_7 {dimension_numbers = #tpu.dot_dimension_numbers<[1], [0], [0], [1], [0, 0, 1, 1], [], []>} : vector<64x64xbf16>, vector<64x256xbf16>, vector<64x256xf32> -> vector<64x256xf32>
    %16 = arith.addf %11, %15 : vector<64x256xf32>
    %c2 = arith.constant 2 : index
    %c0_8 = arith.constant 0 : index
    %c0_9 = arith.constant 0 : index
    %17 = vector.load %arg2[%c2, %c0_8, %c0_9] : memref<5x64x64xbf16, #tpu.memory_space<vmem>>, vector<1x64x64xbf16>
    %18 = vector.shape_cast %17 : vector<1x64x64xbf16> to vector<64x64xbf16>
    %19 = vector.extract_strided_slice %7 {offsets = [0, 2], sizes = [64, 256], strides = [1, 1]} : vector<64x260xbf16> to vector<64x256xbf16>
    %cst_10 = arith.constant dense<0.000000e+00> : vector<64x256xf32>
    %20 = tpu.matmul %18, %19, %cst_10 {dimension_numbers = #tpu.dot_dimension_numbers<[1], [0], [0], [1], [0, 0, 1, 1], [], []>} : vector<64x64xbf16>, vector<64x256xbf16>, vector<64x256xf32> -> vector<64x256xf32>
    %21 = arith.addf %16, %20 : vector<64x256xf32>
    %c3 = arith.constant 3 : index
    %c0_11 = arith.constant 0 : index
    %c0_12 = arith.constant 0 : index
    %22 = vector.load %arg2[%c3, %c0_11, %c0_12] : memref<5x64x64xbf16, #tpu.memory_space<vmem>>, vector<1x64x64xbf16>
    %23 = vector.shape_cast %22 : vector<1x64x64xbf16> to vector<64x64xbf16>
    %24 = vector.extract_strided_slice %7 {offsets = [0, 3], sizes = [64, 256], strides = [1, 1]} : vector<64x260xbf16> to vector<64x256xbf16>
    %cst_13 = arith.constant dense<0.000000e+00> : vector<64x256xf32>
    %25 = tpu.matmul %23, %24, %cst_13 {dimension_numbers = #tpu.dot_dimension_numbers<[1], [0], [0], [1], [0, 0, 1, 1], [], []>} : vector<64x64xbf16>, vector<64x256xbf16>, vector<64x256xf32> -> vector<64x256xf32>
    %26 = arith.addf %21, %25 : vector<64x256xf32>
    %c4 = arith.constant 4 : index
    %c0_14 = arith.constant 0 : index
    %c0_15 = arith.constant 0 : index
    %27 = vector.load %arg2[%c4, %c0_14, %c0_15] : memref<5x64x64xbf16, #tpu.memory_space<vmem>>, vector<1x64x64xbf16>
    %28 = vector.shape_cast %27 : vector<1x64x64xbf16> to vector<64x64xbf16>
    %29 = vector.extract_strided_slice %7 {offsets = [0, 4], sizes = [64, 256], strides = [1, 1]} : vector<64x260xbf16> to vector<64x256xbf16>
    %cst_16 = arith.constant dense<0.000000e+00> : vector<64x256xf32>
    %30 = tpu.matmul %28, %29, %cst_16 {dimension_numbers = #tpu.dot_dimension_numbers<[1], [0], [0], [1], [0, 0, 1, 1], [], []>} : vector<64x64xbf16>, vector<64x256xbf16>, vector<64x256xf32> -> vector<64x256xf32>
    %31 = arith.addf %26, %30 : vector<64x256xf32>
    %c0_17 = arith.constant 0 : index
    %c0_18 = arith.constant 0 : index
    %32 = vector.load %arg3[%c0_17, %c0_18] : memref<64x1xf32, #tpu.memory_space<vmem>>, vector<64x1xf32>
    %33 = vector.broadcast %32 : vector<64x1xf32> to vector<64x256xf32>
    %34 = arith.addf %31, %33 : vector<64x256xf32>
    %cst_19 = arith.constant 0.000000e+00 : f32
    %35 = vector.broadcast %cst_19 : f32 to vector<64x256xf32>
    %36 = arith.maximumf %34, %35 : vector<64x256xf32>
    %cst_20 = arith.constant 0.000000e+00 : f32
    %37 = vector.broadcast %cst_20 : f32 to vector<64x256xf32>
    %38 = arith.select %5, %36, %37 : vector<64x256xi1>, vector<64x256xf32>
    %39 = arith.truncf %38 : vector<64x256xf32> to vector<64x256xbf16>
    %c0_21 = arith.constant 0 : index
    %c0_22 = arith.constant 0 : index
    %40 = vector.load %arg7[%c0_21, %c0_22] : memref<64x256xbf16, #tpu.memory_space<vmem>>, vector<64x256xbf16>
    tpu.vector_store %arg7[%c0_21, %c0_22], %39 {strides = array<i32>} : memref<64x256xbf16, #tpu.memory_space<vmem>>, vector<64x256xbf16>,
    %c0_23 = arith.constant 0 : index
    %c0_24 = arith.constant 0 : index
    %c0_25 = arith.constant 0 : index
    %41 = vector.load %arg4[%c0_23, %c0_24, %c0_25] : memref<5x64x64xbf16, #tpu.memory_space<vmem>>, vector<1x64x64xbf16>
    %42 = vector.shape_cast %41 : vector<1x64x64xbf16> to vector<64x64xbf16>
    %c0_26 = arith.constant 0 : index
    %c0_27 = arith.constant 0 : index
    %43 = vector.load %arg7[%c0_26, %c0_27] : memref<64x256xbf16, #tpu.memory_space<vmem>>, vector<64x252xbf16>
    %cst_28 = arith.constant dense<0.000000e+00> : vector<64x252xf32>
    %44 = tpu.matmul %42, %43, %cst_28 {dimension_numbers = #tpu.dot_dimension_numbers<[1], [0], [0], [1], [0, 0, 1, 1], [], []>} : vector<64x64xbf16>, vector<64x252xbf16>, vector<64x252xf32> -> vector<64x252xf32>
    %c1_29 = arith.constant 1 : index
    %c0_30 = arith.constant 0 : index
    %c0_31 = arith.constant 0 : index
    %45 = vector.load %arg4[%c1_29, %c0_30, %c0_31] : memref<5x64x64xbf16, #tpu.memory_space<vmem>>, vector<1x64x64xbf16>
    %46 = vector.shape_cast %45 : vector<1x64x64xbf16> to vector<64x64xbf16>
    %c0_32 = arith.constant 0 : index
    %c1_33 = arith.constant 1 : index
    %47 = vector.load %arg7[%c0_32, %c1_33] : memref<64x256xbf16, #tpu.memory_space<vmem>>, vector<64x252xbf16>
    %cst_34 = arith.constant dense<0.000000e+00> : vector<64x252xf32>
    %48 = tpu.matmul %46, %47, %cst_34 {dimension_numbers = #tpu.dot_dimension_numbers<[1], [0], [0], [1], [0, 0, 1, 1], [], []>} : vector<64x64xbf16>, vector<64x252xbf16>, vector<64x252xf32> -> vector<64x252xf32>
    %49 = arith.addf %44, %48 : vector<64x252xf32>
    %c2_35 = arith.constant 2 : index
    %c0_36 = arith.constant 0 : index
    %c0_37 = arith.constant 0 : index
    %50 = vector.load %arg4[%c2_35, %c0_36, %c0_37] : memref<5x64x64xbf16, #tpu.memory_space<vmem>>, vector<1x64x64xbf16>
    %51 = vector.shape_cast %50 : vector<1x64x64xbf16> to vector<64x64xbf16>
    %c0_38 = arith.constant 0 : index
    %c2_39 = arith.constant 2 : index
    %52 = vector.load %arg7[%c0_38, %c2_39] : memref<64x256xbf16, #tpu.memory_space<vmem>>, vector<64x252xbf16>
    %cst_40 = arith.constant dense<0.000000e+00> : vector<64x252xf32>
    %53 = tpu.matmul %51, %52, %cst_40 {dimension_numbers = #tpu.dot_dimension_numbers<[1], [0], [0], [1], [0, 0, 1, 1], [], []>} : vector<64x64xbf16>, vector<64x252xbf16>, vector<64x252xf32> -> vector<64x252xf32>
    %54 = arith.addf %49, %53 : vector<64x252xf32>
    %c3_41 = arith.constant 3 : index
    %c0_42 = arith.constant 0 : index
    %c0_43 = arith.constant 0 : index
    %55 = vector.load %arg4[%c3_41, %c0_42, %c0_43] : memref<5x64x64xbf16, #tpu.memory_space<vmem>>, vector<1x64x64xbf16>
    %56 = vector.shape_cast %55 : vector<1x64x64xbf16> to vector<64x64xbf16>
    %c0_44 = arith.constant 0 : index
    %c3_45 = arith.constant 3 : index
    %57 = vector.load %arg7[%c0_44, %c3_45] : memref<64x256xbf16, #tpu.memory_space<vmem>>, vector<64x252xbf16>
    %cst_46 = arith.constant dense<0.000000e+00> : vector<64x252xf32>
    %58 = tpu.matmul %56, %57, %cst_46 {dimension_numbers = #tpu.dot_dimension_numbers<[1], [0], [0], [1], [0, 0, 1, 1], [], []>} : vector<64x64xbf16>, vector<64x252xbf16>, vector<64x252xf32> -> vector<64x252xf32>
    %59 = arith.addf %54, %58 : vector<64x252xf32>
    %c4_47 = arith.constant 4 : index
    %c0_48 = arith.constant 0 : index
    %c0_49 = arith.constant 0 : index
    %60 = vector.load %arg4[%c4_47, %c0_48, %c0_49] : memref<5x64x64xbf16, #tpu.memory_space<vmem>>, vector<1x64x64xbf16>
    %61 = vector.shape_cast %60 : vector<1x64x64xbf16> to vector<64x64xbf16>
    %c0_50 = arith.constant 0 : index
    %c4_51 = arith.constant 4 : index
    %62 = vector.load %arg7[%c0_50, %c4_51] : memref<64x256xbf16, #tpu.memory_space<vmem>>, vector<64x252xbf16>
    %cst_52 = arith.constant dense<0.000000e+00> : vector<64x252xf32>
    %63 = tpu.matmul %61, %62, %cst_52 {dimension_numbers = #tpu.dot_dimension_numbers<[1], [0], [0], [1], [0, 0, 1, 1], [], []>} : vector<64x64xbf16>, vector<64x252xbf16>, vector<64x252xf32> -> vector<64x252xf32>
    %64 = arith.addf %59, %63 : vector<64x252xf32>
    %c0_53 = arith.constant 0 : index
    %c0_54 = arith.constant 0 : index
    %65 = vector.load %arg5[%c0_53, %c0_54] : memref<64x1xf32, #tpu.memory_space<vmem>>, vector<64x1xf32>
    %66 = vector.broadcast %65 : vector<64x1xf32> to vector<64x252xf32>
    %67 = arith.addf %64, %66 : vector<64x252xf32>
    %68 = vector.extract_strided_slice %7 {offsets = [0, 2], sizes = [64, 252], strides = [1, 1]} : vector<64x260xbf16> to vector<64x252xbf16>
    %69 = arith.extf %68 : vector<64x252xbf16> to vector<64x252xf32>
    %70 = arith.addf %67, %69 : vector<64x252xf32>
    %cst_55 = arith.constant 0.000000e+00 : f32
    %71 = vector.broadcast %cst_55 : f32 to vector<64x252xf32>
    %72 = arith.maximumf %70, %71 : vector<64x252xf32>
    %c0_56 = arith.constant 0 : index
    %c0_57 = arith.constant 0 : index
    %c0_58 = arith.constant 0 : index
    %73 = vector.load %arg6[%c0_56, %c0_57, %c0_58] : memref<2x64x252xf32, #tpu.memory_space<vmem>>, vector<1x64x252xf32>
    %74 = vector.shape_cast %73 : vector<1x64x252xf32> to vector<64x252xf32>
    %75 = vector.shape_cast %72 : vector<64x252xf32> to vector<1x64x252xf32>
    tpu.vector_store %arg6[%c0_56, %c0_57, %c0_58], %75 {strides = array<i32>} : memref<2x64x252xf32, #tpu.memory_space<vmem>>, vector<1x64x252xf32>,
    %c1_59 = arith.constant 1 : index
    %c0_60 = arith.constant 0 : index
    %c0_61 = arith.constant 0 : index
    %76 = vector.load %arg1[%c1_59, %c0_60, %c0_61] : memref<2x64x260xbf16, #tpu.memory_space<vmem>>, vector<1x64x260xbf16>
    %77 = vector.shape_cast %76 : vector<1x64x260xbf16> to vector<64x260xbf16>
    %c0_62 = arith.constant 0 : index
    %c0_63 = arith.constant 0 : index
    %c0_64 = arith.constant 0 : index
    %78 = vector.load %arg2[%c0_62, %c0_63, %c0_64] : memref<5x64x64xbf16, #tpu.memory_space<vmem>>, vector<1x64x64xbf16>
    %79 = vector.shape_cast %78 : vector<1x64x64xbf16> to vector<64x64xbf16>
    %80 = vector.extract_strided_slice %77 {offsets = [0, 0], sizes = [64, 256], strides = [1, 1]} : vector<64x260xbf16> to vector<64x256xbf16>
    %cst_65 = arith.constant dense<0.000000e+00> : vector<64x256xf32>
    %81 = tpu.matmul %79, %80, %cst_65 {dimension_numbers = #tpu.dot_dimension_numbers<[1], [0], [0], [1], [0, 0, 1, 1], [], []>} : vector<64x64xbf16>, vector<64x256xbf16>, vector<64x256xf32> -> vector<64x256xf32>
    %c1_66 = arith.constant 1 : index
    %c0_67 = arith.constant 0 : index
    %c0_68 = arith.constant 0 : index
    %82 = vector.load %arg2[%c1_66, %c0_67, %c0_68] : memref<5x64x64xbf16, #tpu.memory_space<vmem>>, vector<1x64x64xbf16>
    %83 = vector.shape_cast %82 : vector<1x64x64xbf16> to vector<64x64xbf16>
    %84 = vector.extract_strided_slice %77 {offsets = [0, 1], sizes = [64, 256], strides = [1, 1]} : vector<64x260xbf16> to vector<64x256xbf16>
    %cst_69 = arith.constant dense<0.000000e+00> : vector<64x256xf32>
    %85 = tpu.matmul %83, %84, %cst_69 {dimension_numbers = #tpu.dot_dimension_numbers<[1], [0], [0], [1], [0, 0, 1, 1], [], []>} : vector<64x64xbf16>, vector<64x256xbf16>, vector<64x256xf32> -> vector<64x256xf32>
    %86 = arith.addf %81, %85 : vector<64x256xf32>
    %c2_70 = arith.constant 2 : index
    %c0_71 = arith.constant 0 : index
    %c0_72 = arith.constant 0 : index
    %87 = vector.load %arg2[%c2_70, %c0_71, %c0_72] : memref<5x64x64xbf16, #tpu.memory_space<vmem>>, vector<1x64x64xbf16>
    %88 = vector.shape_cast %87 : vector<1x64x64xbf16> to vector<64x64xbf16>
    %89 = vector.extract_strided_slice %77 {offsets = [0, 2], sizes = [64, 256], strides = [1, 1]} : vector<64x260xbf16> to vector<64x256xbf16>
    %cst_73 = arith.constant dense<0.000000e+00> : vector<64x256xf32>
    %90 = tpu.matmul %88, %89, %cst_73 {dimension_numbers = #tpu.dot_dimension_numbers<[1], [0], [0], [1], [0, 0, 1, 1], [], []>} : vector<64x64xbf16>, vector<64x256xbf16>, vector<64x256xf32> -> vector<64x256xf32>
    %91 = arith.addf %86, %90 : vector<64x256xf32>
    %c3_74 = arith.constant 3 : index
    %c0_75 = arith.constant 0 : index
    %c0_76 = arith.constant 0 : index
    %92 = vector.load %arg2[%c3_74, %c0_75, %c0_76] : memref<5x64x64xbf16, #tpu.memory_space<vmem>>, vector<1x64x64xbf16>
    %93 = vector.shape_cast %92 : vector<1x64x64xbf16> to vector<64x64xbf16>
    %94 = vector.extract_strided_slice %77 {offsets = [0, 3], sizes = [64, 256], strides = [1, 1]} : vector<64x260xbf16> to vector<64x256xbf16>
    %cst_77 = arith.constant dense<0.000000e+00> : vector<64x256xf32>
    %95 = tpu.matmul %93, %94, %cst_77 {dimension_numbers = #tpu.dot_dimension_numbers<[1], [0], [0], [1], [0, 0, 1, 1], [], []>} : vector<64x64xbf16>, vector<64x256xbf16>, vector<64x256xf32> -> vector<64x256xf32>
    %96 = arith.addf %91, %95 : vector<64x256xf32>
    %c4_78 = arith.constant 4 : index
    %c0_79 = arith.constant 0 : index
    %c0_80 = arith.constant 0 : index
    %97 = vector.load %arg2[%c4_78, %c0_79, %c0_80] : memref<5x64x64xbf16, #tpu.memory_space<vmem>>, vector<1x64x64xbf16>
    %98 = vector.shape_cast %97 : vector<1x64x64xbf16> to vector<64x64xbf16>
    %99 = vector.extract_strided_slice %77 {offsets = [0, 4], sizes = [64, 256], strides = [1, 1]} : vector<64x260xbf16> to vector<64x256xbf16>
    %cst_81 = arith.constant dense<0.000000e+00> : vector<64x256xf32>
    %100 = tpu.matmul %98, %99, %cst_81 {dimension_numbers = #tpu.dot_dimension_numbers<[1], [0], [0], [1], [0, 0, 1, 1], [], []>} : vector<64x64xbf16>, vector<64x256xbf16>, vector<64x256xf32> -> vector<64x256xf32>
    %101 = arith.addf %96, %100 : vector<64x256xf32>
    %c0_82 = arith.constant 0 : index
    %c0_83 = arith.constant 0 : index
    %102 = vector.load %arg3[%c0_82, %c0_83] : memref<64x1xf32, #tpu.memory_space<vmem>>, vector<64x1xf32>
    %103 = vector.broadcast %102 : vector<64x1xf32> to vector<64x256xf32>
    %104 = arith.addf %101, %103 : vector<64x256xf32>
    %cst_84 = arith.constant 0.000000e+00 : f32
    %105 = vector.broadcast %cst_84 : f32 to vector<64x256xf32>
    %106 = arith.maximumf %104, %105 : vector<64x256xf32>
    %cst_85 = arith.constant 0.000000e+00 : f32
    %107 = vector.broadcast %cst_85 : f32 to vector<64x256xf32>
    %108 = arith.select %5, %106, %107 : vector<64x256xi1>, vector<64x256xf32>
    %109 = arith.truncf %108 : vector<64x256xf32> to vector<64x256xbf16>
    %c0_86 = arith.constant 0 : index
    %c0_87 = arith.constant 0 : index
    %110 = vector.load %arg7[%c0_86, %c0_87] : memref<64x256xbf16, #tpu.memory_space<vmem>>, vector<64x256xbf16>
    tpu.vector_store %arg7[%c0_86, %c0_87], %109 {strides = array<i32>} : memref<64x256xbf16, #tpu.memory_space<vmem>>, vector<64x256xbf16>,
    %c0_88 = arith.constant 0 : index
    %c0_89 = arith.constant 0 : index
    %c0_90 = arith.constant 0 : index
    %111 = vector.load %arg4[%c0_88, %c0_89, %c0_90] : memref<5x64x64xbf16, #tpu.memory_space<vmem>>, vector<1x64x64xbf16>
    %112 = vector.shape_cast %111 : vector<1x64x64xbf16> to vector<64x64xbf16>
    %c0_91 = arith.constant 0 : index
    %c0_92 = arith.constant 0 : index
    %113 = vector.load %arg7[%c0_91, %c0_92] : memref<64x256xbf16, #tpu.memory_space<vmem>>, vector<64x252xbf16>
    %cst_93 = arith.constant dense<0.000000e+00> : vector<64x252xf32>
    %114 = tpu.matmul %112, %113, %cst_93 {dimension_numbers = #tpu.dot_dimension_numbers<[1], [0], [0], [1], [0, 0, 1, 1], [], []>} : vector<64x64xbf16>, vector<64x252xbf16>, vector<64x252xf32> -> vector<64x252xf32>
    %c1_94 = arith.constant 1 : index
    %c0_95 = arith.constant 0 : index
    %c0_96 = arith.constant 0 : index
    %115 = vector.load %arg4[%c1_94, %c0_95, %c0_96] : memref<5x64x64xbf16, #tpu.memory_space<vmem>>, vector<1x64x64xbf16>
    %116 = vector.shape_cast %115 : vector<1x64x64xbf16> to vector<64x64xbf16>
    %c0_97 = arith.constant 0 : index
    %c1_98 = arith.constant 1 : index
    %117 = vector.load %arg7[%c0_97, %c1_98] : memref<64x256xbf16, #tpu.memory_space<vmem>>, vector<64x252xbf16>
    %cst_99 = arith.constant dense<0.000000e+00> : vector<64x252xf32>
    %118 = tpu.matmul %116, %117, %cst_99 {dimension_numbers = #tpu.dot_dimension_numbers<[1], [0], [0], [1], [0, 0, 1, 1], [], []>} : vector<64x64xbf16>, vector<64x252xbf16>, vector<64x252xf32> -> vector<64x252xf32>
    %119 = arith.addf %114, %118 : vector<64x252xf32>
    %c2_100 = arith.constant 2 : index
    %c0_101 = arith.constant 0 : index
    %c0_102 = arith.constant 0 : index
    %120 = vector.load %arg4[%c2_100, %c0_101, %c0_102] : memref<5x64x64xbf16, #tpu.memory_space<vmem>>, vector<1x64x64xbf16>
    %121 = vector.shape_cast %120 : vector<1x64x64xbf16> to vector<64x64xbf16>
    %c0_103 = arith.constant 0 : index
    %c2_104 = arith.constant 2 : index
    %122 = vector.load %arg7[%c0_103, %c2_104] : memref<64x256xbf16, #tpu.memory_space<vmem>>, vector<64x252xbf16>
    %cst_105 = arith.constant dense<0.000000e+00> : vector<64x252xf32>
    %123 = tpu.matmul %121, %122, %cst_105 {dimension_numbers = #tpu.dot_dimension_numbers<[1], [0], [0], [1], [0, 0, 1, 1], [], []>} : vector<64x64xbf16>, vector<64x252xbf16>, vector<64x252xf32> -> vector<64x252xf32>
    %124 = arith.addf %119, %123 : vector<64x252xf32>
    %c3_106 = arith.constant 3 : index
    %c0_107 = arith.constant 0 : index
    %c0_108 = arith.constant 0 : index
    %125 = vector.load %arg4[%c3_106, %c0_107, %c0_108] : memref<5x64x64xbf16, #tpu.memory_space<vmem>>, vector<1x64x64xbf16>
    %126 = vector.shape_cast %125 : vector<1x64x64xbf16> to vector<64x64xbf16>
    %c0_109 = arith.constant 0 : index
    %c3_110 = arith.constant 3 : index
    %127 = vector.load %arg7[%c0_109, %c3_110] : memref<64x256xbf16, #tpu.memory_space<vmem>>, vector<64x252xbf16>
    %cst_111 = arith.constant dense<0.000000e+00> : vector<64x252xf32>
    %128 = tpu.matmul %126, %127, %cst_111 {dimension_numbers = #tpu.dot_dimension_numbers<[1], [0], [0], [1], [0, 0, 1, 1], [], []>} : vector<64x64xbf16>, vector<64x252xbf16>, vector<64x252xf32> -> vector<64x252xf32>
    %129 = arith.addf %124, %128 : vector<64x252xf32>
    %c4_112 = arith.constant 4 : index
    %c0_113 = arith.constant 0 : index
    %c0_114 = arith.constant 0 : index
    %130 = vector.load %arg4[%c4_112, %c0_113, %c0_114] : memref<5x64x64xbf16, #tpu.memory_space<vmem>>, vector<1x64x64xbf16>
    %131 = vector.shape_cast %130 : vector<1x64x64xbf16> to vector<64x64xbf16>
    %c0_115 = arith.constant 0 : index
    %c4_116 = arith.constant 4 : index
    %132 = vector.load %arg7[%c0_115, %c4_116] : memref<64x256xbf16, #tpu.memory_space<vmem>>, vector<64x252xbf16>
    %cst_117 = arith.constant dense<0.000000e+00> : vector<64x252xf32>
    %133 = tpu.matmul %131, %132, %cst_117 {dimension_numbers = #tpu.dot_dimension_numbers<[1], [0], [0], [1], [0, 0, 1, 1], [], []>} : vector<64x64xbf16>, vector<64x252xbf16>, vector<64x252xf32> -> vector<64x252xf32>
    %134 = arith.addf %129, %133 : vector<64x252xf32>
    %c0_118 = arith.constant 0 : index
    %c0_119 = arith.constant 0 : index
    %135 = vector.load %arg5[%c0_118, %c0_119] : memref<64x1xf32, #tpu.memory_space<vmem>>, vector<64x1xf32>
    %136 = vector.broadcast %135 : vector<64x1xf32> to vector<64x252xf32>
    %137 = arith.addf %134, %136 : vector<64x252xf32>
    %138 = vector.extract_strided_slice %77 {offsets = [0, 2], sizes = [64, 252], strides = [1, 1]} : vector<64x260xbf16> to vector<64x252xbf16>
    %139 = arith.extf %138 : vector<64x252xbf16> to vector<64x252xf32>
    %140 = arith.addf %137, %139 : vector<64x252xf32>
    %cst_120 = arith.constant 0.000000e+00 : f32
    %141 = vector.broadcast %cst_120 : f32 to vector<64x252xf32>
    %142 = arith.maximumf %140, %141 : vector<64x252xf32>
    %c1_121 = arith.constant 1 : index
    %c0_122 = arith.constant 0 : index
    %c0_123 = arith.constant 0 : index
    %143 = vector.load %arg6[%c1_121, %c0_122, %c0_123] : memref<2x64x252xf32, #tpu.memory_space<vmem>>, vector<1x64x252xf32>
    %144 = vector.shape_cast %143 : vector<1x64x252xf32> to vector<64x252xf32>
    %145 = vector.shape_cast %142 : vector<64x252xf32> to vector<1x64x252xf32>
    tpu.vector_store %arg6[%c1_121, %c0_122, %c0_123], %145 {strides = array<i32>} : memref<2x64x252xf32, #tpu.memory_space<vmem>>, vector<1x64x252xf32>,
    return
  }
  func.func @transform_0(%arg0: i32) -> (i32, i32, i32) {
    %c0_i32 = arith.constant 0 : i32
    %c0_i32_0 = arith.constant 0 : i32
    %c0_i32_1 = arith.constant 0 : i32
    return %arg0, %c0_i32, %c0_i32_0 : i32, i32, i32
  }
  func.func @transform_1(%arg0: i32) -> (i32, i32, i32) {
    %c0_i32 = arith.constant 0 : i32
    %c0_i32_0 = arith.constant 0 : i32
    %c0_i32_1 = arith.constant 0 : i32
    %c0_i32_2 = arith.constant 0 : i32
    return %c0_i32, %c0_i32_0, %c0_i32_1 : i32, i32, i32
  }
  func.func @transform_2(%arg0: i32) -> (i32, i32) {
    %c0_i32 = arith.constant 0 : i32
    %c0_i32_0 = arith.constant 0 : i32
    %c0_i32_1 = arith.constant 0 : i32
    return %c0_i32, %c0_i32_0 : i32, i32
  }
  func.func @transform_3(%arg0: i32) -> (i32, i32, i32) {
    %c0_i32 = arith.constant 0 : i32
    %c0_i32_0 = arith.constant 0 : i32
    %c0_i32_1 = arith.constant 0 : i32
    %c0_i32_2 = arith.constant 0 : i32
    return %c0_i32, %c0_i32_0, %c0_i32_1 : i32, i32, i32
  }
  func.func @transform_4(%arg0: i32) -> (i32, i32) {
    %c0_i32 = arith.constant 0 : i32
    %c0_i32_0 = arith.constant 0 : i32
    %c0_i32_1 = arith.constant 0 : i32
    return %c0_i32, %c0_i32_0 : i32, i32
  }
  func.func @transform_5(%arg0: i32) -> (i32, i32, i32) {
    %c0_i32 = arith.constant 0 : i32
    %c0_i32_0 = arith.constant 0 : i32
    %c0_i32_1 = arith.constant 0 : i32
    return %arg0, %c0_i32, %c0_i32_0 : i32, i32, i32
  }
}

</mosaic_0001>

<bundles_post_ra>
// kernel: basic_block_forward.1
= control target key start
LH: loop header
LB: loop body
LE: loop exit
PB: predicated region body
PF: predicated region fallthrough
CT: control target
= control target key end

     0   :  { %10 = vsyncpa [#allocation4], 0  ;;  %s6599_s0 = inlined_call_operand.vmem [shape: bf16[4,64,260], index: 0, kind: input, shape index: {}]   ;;  %s6600_s1 = inlined_call_operand.vmem [shape: bf16[5,64,64], index: 1, kind: input, shape index: {}]   ;;  %s6601_s2 = inlined_call_operand.vmem [shape: f32[64,1], index: 2, kind: input, shape index: {}]   ;;  %s6602_s3 = inlined_call_operand.vmem [shape: bf16[5,64,64], index: 3, kind: input, shape index: {}]   ;;  %s6603_s4 = inlined_call_operand.vmem [shape: f32[64,1], index: 4, kind: input, shape index: {}]   ;;  %s6604_s5 = inlined_call_operand.hbm [shape: f32[4,64,252], index: 5, kind: output, shape index: {}]  }
   0x1   :  { %12 = vsyncpa [#allocation4 + $0x1], 0  ;;  %s5151_s18 = smov 0   ;;  %s5153_s19 = smov 0  }
   0x2   :  { %s5155_s20 = smov 0   ;;  %s5157_s21 = smov 0  }
   0x3 LB: > { %s5172_s22 = sadd.s32 4294967295, %s5111_s21   ;;  %s4137_s23 = sadd.s32 4294967294, %s5111_s21   ;;  %s5111_s21 = sphi %s5157_s21, %s6614_s21   ;;  %s5107_s20 = sphi %s5155_s20, %s6613_s20   ;;  %s5103_s19 = sphi %s5153_s19, %s6612_s19   ;;  %s5099_s18 = sphi %s5151_s18, %s6611_s18  }
   0x4   : > { %s5176_s24 = sadd.s32 1, %s5111_s21   ;;  %s135_s25 = sadd.s32 1, %s5107_s20 }
   0x5   : > { %s132_s26 = ssub.s32 %s5111_s21, %s5176_s24  ;;  %p145_p0 = scmp.ne.s32.totalorder %s5107_s20, %s5103_s19 }
   0x6   : > { %p133_p1 = scmp.eq.s32.totalorder %s132_s26, 0  ;;  %p146_p2 = scmp.eq.s32.totalorder %s5172_s22, 1 }
   0x7   : > { %p151_p3 = scmp.ne.s32.totalorder %s5103_s19, %s5099_s18  ;;  %p152_p4 = scmp.eq.s32.totalorder %s4137_s23, 1 }
   0x8   : > { %s5187_s27 = scalar_select %p133_p1, %s5107_s20, %s135_s25  }
   0x9   : > { %p5189_p5 = por %p146_p2, %p145_p0  ;;  %p5193_p6 = por %p152_p4, %p151_p3 }
   0xa   : > { %p4140_p7 = scmp.ge.s32.totalorder %s5111_s21, 1  ;;  %p192_p8 = scmp.lt.s32.totalorder %s5111_s21, 3 }
   0xc   : > { %p193_p9 = pnand %p4140_p7, %p192_p8 }
   0xd   : > { %s4142_s30 = sshll.u32 (!%p193_p9), %s5172_s22, 1  ;;  %s5113_s10 = smov (!%p193_p9), 127   ;;  %v5114_v16 = vmov (!%p193_p9), 0   ;;  %vm368_vm0 = vcmask (!%p193_p9), 1039360   ;;  %v4941_v61 = vld [vmem:[%s6600_s1 + $0x20] sm:$0xff] (!%p193_p9)   ;;  %vm385_vm1 = vcmask (!%p193_p9), 523264  }
   0xe   : > { %196 = sbr.rel (%p193_p9) target bundleno = 1225 (0x4c9), region = 40  ;;  %p222_p10 = scmp.lt.s32.totalorder (!%p193_p9), %s4142_s30, 3  ;;  %430 = vmatprep.mubr.bf16.mxu0 (!%p193_p9), %v5114_v16  ;;  %4847 = vset.pattern.permute.xlu0 (!%p193_p9), %v5114_v16  ;;  %vm637_vm2 = vcmask (!%p193_p9), 1031168   ;;  %vm808_vm3 = vcmask (!%p193_p9), 1022976   ;;  %vm979_vm4 = vcmask (!%p193_p9), 1014784  }
   0xf   : > { %4848 = vset.pattern.permute.xlu1 (!%p193_p9), %v5114_v16  ;;  %1334 = vmatprep.mubr.bf16.mxu1 (!%p193_p9), %v5114_v16  ;;  %s5115_s11 = smov (!%p193_p9), 126   ;;  %s5116_s12 = smov (!%p193_p9), 125  }
  0x10   : > { %s5117_s13 = smov (!%p193_p9), 124   ;;  %s4495_s8 = sshll.u32 (!%p193_p9), %s5172_s22, 12 }
  0x11   : > { %s6547_s16 = scalar_lea.hbm (!%p193_p9), %s6604_s5, %s4495_s8 }
  0x15   : > { %s6616_s30 = smov (!%p222_p10, %s4142_s30), 3 }
  0x16   : > { %s4800_s6 = smul.u32 96, %s6616_s30 }
  0x18   : > { %s5203_s9 = scalar_lea.vmem %s6599_s0, %s4800_s6 }
  0x19   : > { %v239_v0 = vld [vmem:[%s5203_s9] sm:$0xff]  ;;  %v241_v1 = vld [vmem:[%s5203_s9 + $0xc] sm:$0xff]  ;;  %v243_v4 = vld [vmem:[%s5203_s9 + $0x18] sm:$0xff] }
  0x1a   : > { %v5207_v2 = vcombine.high %v239_v0, %v241_v1  ;;  %v5209_v3 = vcombine.low %v239_v0, %v241_v1  ;;  %v245_v5 = vld [vmem:[%s5203_s9 + $0x24] sm:$0xff]  ;;  %v4933_v8 = vld [vmem:[%s5203_s9 + $0x20] ss:$12 sps:$4 sm:$0xff]   ;;  %v247_v9 = vld [vmem:[%s5203_s9 + $0x30] sm:$0xff] }
  0x1b   : > { %v4931_v6 = vld [vmem:[%s5203_s9 + $0x8] ss:$12 sps:$4 sm:$0xff]   ;;  %v5218_v7 = vcombine.high %v243_v4, %v245_v5  ;;  %v249_v10 = vld [vmem:[%s5203_s9 + $0x3c] sm:$0xff]  ;;  %v5226_v11 = vcombine.low %v243_v4, %v245_v5  ;;  %v4936_v12 = vld [vmem:[%s5203_s9 + $0x38] ss:$12 sps:$4 sm:$0xff]  }
  0x1c   : > { %346 = vrot.lane.b32.xlu0 %v5207_v2, %s5113_s10  ;;  %344 = vrot.lane.b32.xlu1 %v5209_v3, %s5113_s10  ;;  %v5232_v13 = vcombine.high %v247_v9, %v249_v10  ;;  %v251_v14 = vld [vmem:[%s5203_s9 + $0x48] sm:$0xff]  ;;  %v253_v15 = vld [vmem:[%s5203_s9 + $0x54] sm:$0xff]  ;;  %v5243_v17 = vcombine.low %v247_v9, %v249_v10 }
  0x1d   : > { %v5245_v18 = vcombine.high %v251_v14, %v253_v15  ;;  %v4939_v19 = vld [vmem:[%s5203_s9 + $0x50] ss:$12 sps:$4 sm:$0xff]   ;;  %v5252_v20 = vcombine.low %v251_v14, %v253_v15  ;;  %v4300_v21 = vld [vmem:[%s5203_s9 + $0x60] sm:$0xff]  ;;  %v5322_v24 = vld [vmem:[%s5203_s9 + $0x68] ss:$12 sps:$4 sm:$0xff]  }
  0x1e   : > { %v4302_v22 = vld [vmem:[%s5203_s9 + $0x6c] sm:$0xff]  ;;  %v4304_v25 = vld [vmem:[%s5203_s9 + $0x78] sm:$0xff]  ;;  %v4306_v26 = vld [vmem:[%s5203_s9 + $0x84] sm:$0xff] }
  0x1f   : > { %v5319_v23 = vcombine.high %v4300_v21, %v4302_v22  ;;  %v5330_v27 = vcombine.low %v4300_v21, %v4302_v22  ;;  %v5332_v28 = vcombine.high %v4304_v25, %v4306_v26  ;;  %v5339_v29 = vld [vmem:[%s5203_s9 + $0x80] ss:$12 sps:$4 sm:$0xff]   ;;  %v5341_v30 = vcombine.low %v4304_v25, %v4306_v26  ;;  %v4308_v31 = vld [vmem:[%s5203_s9 + $0x90] sm:$0xff]  ;;  %v5352_v34 = vld [vmem:[%s5203_s9 + $0x98] ss:$12 sps:$4 sm:$0xff]  }
  0x20   : > { %348 = vrot.lane.b32.xlu0 %v4931_v6, %s5113_s10  ;;  %352 = vrot.lane.b32.xlu1 %v5218_v7, %s5113_s10  ;;  %v4310_v32 = vld [vmem:[%s5203_s9 + $0x9c] sm:$0xff]  ;;  %v4312_v35 = vld [vmem:[%s5203_s9 + $0xa8] sm:$0xff] }
  0x21   : > { %v5349_v33 = vcombine.high %v4308_v31, %v4310_v32  ;;  %v4314_v36 = vld [vmem:[%s5203_s9 + $0xb4] sm:$0xff]  ;;  %v5360_v37 = vcombine.low %v4308_v31, %v4310_v32  ;;  %v5369_v39 = vld [vmem:[%s5203_s9 + $0xb0] ss:$12 sps:$4 sm:$0xff]   ;;  %v4942_v0 = vld [vmem:[%s6600_s1 + $0x28] sm:$0xff]  }
  0x22   : > { %v5362_v38 = vcombine.high %v4312_v35, %v4314_v36  ;;  %v5371_v40 = vcombine.low %v4312_v35, %v4314_v36  ;;  %v4943_v4 = vld [vmem:[%s6600_s1 + $0x30] sm:$0xff]   ;;  %v4957_v21 = vld [vmem:[%s6600_s1 + $0x8] sm:$0xff]  }
  0x23   : > { %v4959_v35 = vld [vmem:[%s6600_s1 + $0x10] sm:$0xff]  }
  0x24   : > { %354 = vrot.lane.b32.xlu0 %v4933_v8, %s5113_s10  ;;  %350 = vrot.lane.b32.xlu1 %v5226_v11, %s5113_s10 }
  0x28   : > { %358 = vrot.lane.b32.xlu0 %v5232_v13, %s5113_s10  ;;  %360 = vrot.lane.b32.xlu1 %v4936_v12, %s5113_s10 }
  0x2c   : > { %356 = vrot.lane.b32.xlu0 %v5243_v17, %s5113_s10  ;;  %364 = vrot.lane.b32.xlu1 %v5245_v18, %s5113_s10 }
  0x30   : > { %366 = vrot.lane.b32.xlu0 %v4939_v19, %s5113_s10  ;;  %362 = vrot.lane.b32.xlu1 %v5252_v20, %s5113_s10 }
  0x34   : > { %615 = vrot.lane.b32.xlu0 %v5207_v2, %s5115_s11  ;;  %617 = vrot.lane.b32.xlu1 %v4931_v6, %s5115_s11 }
  0x38   : > { %613 = vrot.lane.b32.xlu0 %v5209_v3, %s5115_s11  ;;  %621 = vrot.lane.b32.xlu1 %v5218_v7, %s5115_s11 }
  0x3c   : > { %623 = vrot.lane.b32.xlu0 %v4933_v8, %s5115_s11  ;;  %619 = vrot.lane.b32.xlu1 %v5226_v11, %s5115_s11 }
  0x40   : > { %627 = vrot.lane.b32.xlu0 %v5232_v13, %s5115_s11  ;;  %629 = vrot.lane.b32.xlu1 %v4936_v12, %s5115_s11 }
  0x44   : > { %625 = vrot.lane.b32.xlu0 %v5243_v17, %s5115_s11  ;;  %633 = vrot.lane.b32.xlu1 %v5245_v18, %s5115_s11 }
  0x48   : > { %635 = vrot.lane.b32.xlu0 %v4939_v19, %s5115_s11  ;;  %631 = vrot.lane.b32.xlu1 %v5252_v20, %s5115_s11 }
  0x4c   : > { %786 = vrot.lane.b32.xlu0 %v5207_v2, %s5116_s12  ;;  %788 = vrot.lane.b32.xlu1 %v4931_v6, %s5116_s12 }
  0x50   : > { %784 = vrot.lane.b32.xlu0 %v5209_v3, %s5116_s12  ;;  %792 = vrot.lane.b32.xlu1 %v5218_v7, %s5116_s12 }
  0x54   : > { %794 = vrot.lane.b32.xlu0 %v4933_v8, %s5116_s12  ;;  %790 = vrot.lane.b32.xlu1 %v5226_v11, %s5116_s12 }
  0x58   : > { %798 = vrot.lane.b32.xlu0 %v5232_v13, %s5116_s12  ;;  %800 = vrot.lane.b32.xlu1 %v4936_v12, %s5116_s12 }
  0x5c   : > { %796 = vrot.lane.b32.xlu0 %v5243_v17, %s5116_s12  ;;  %804 = vrot.lane.b32.xlu1 %v5245_v18, %s5116_s12 }
  0x60   : > { %806 = vrot.lane.b32.xlu0 %v4939_v19, %s5116_s12  ;;  %802 = vrot.lane.b32.xlu1 %v5252_v20, %s5116_s12 }
  0x64   : > { %957 = vrot.lane.b32.xlu0 %v5207_v2, %s5117_s13  ;;  %959 = vrot.lane.b32.xlu1 %v4931_v6, %s5117_s13 }
  0x68   : > { %955 = vrot.lane.b32.xlu0 %v5209_v3, %s5117_s13  ;;  %963 = vrot.lane.b32.xlu1 %v5218_v7, %s5117_s13 }
  0x6c   : > { %965 = vrot.lane.b32.xlu0 %v4933_v8, %s5117_s13  ;;  %961 = vrot.lane.b32.xlu1 %v5226_v11, %s5117_s13  ;;  %v4947_v8 = vld [vmem:[%s6600_s1 + $0x38] sm:$0xff]  }
  0x70   : > { %969 = vrot.lane.b32.xlu0 %v5232_v13, %s5117_s13  ;;  %971 = vrot.lane.b32.xlu1 %v4936_v12, %s5117_s13  ;;  %v4952_v12 = vld [vmem:[%s6600_s1] sm:$0xff]  }
  0x74   : > { %967 = vrot.lane.b32.xlu0 %v5243_v17, %s5117_s13  ;;  %975 = vrot.lane.b32.xlu1 %v5245_v18, %s5117_s13 }
  0x78   : > { %977 = vrot.lane.b32.xlu0 %v4939_v19, %s5117_s13  ;;  %973 = vrot.lane.b32.xlu1 %v5252_v20, %s5117_s13 }
  0x7c   : > { %2263 = vrot.lane.b32.xlu0 %v5319_v23, %s5113_s10  ;;  %2265 = vrot.lane.b32.xlu1 %v5322_v24, %s5113_s10 }
  0x80   : > { %2261 = vrot.lane.b32.xlu0 %v5330_v27, %s5113_s10  ;;  %2269 = vrot.lane.b32.xlu1 %v5332_v28, %s5113_s10 }
  0x84   : > { %2271 = vrot.lane.b32.xlu0 %v5339_v29, %s5113_s10  ;;  %2267 = vrot.lane.b32.xlu1 %v5341_v30, %s5113_s10 }
  0x88   : > { %2275 = vrot.lane.b32.xlu0 %v5349_v33, %s5113_s10  ;;  %2277 = vrot.lane.b32.xlu1 %v5352_v34, %s5113_s10 }
  0x8c   : > { %2273 = vrot.lane.b32.xlu0 %v5360_v37, %s5113_s10  ;;  %2281 = vrot.lane.b32.xlu1 %v5362_v38, %s5113_s10 }
  0x8e   : > { %v347_v41 = vpop.permute.xlu0 %346  ;;  %v345_v42 = vpop.permute.xlu1 %344 }
  0x8f   : > { %v369_v46 = vsel %vm368_vm0, %v345_v42, %v347_v41 }
  0x90   : > { %2283 = vrot.lane.b32.xlu0 %v5369_v39, %s5113_s10  ;;  %2279 = vrot.lane.b32.xlu1 %v5371_v40, %s5113_s10 }
  0x92   : > { %v349_v43 = vpop.permute.xlu0 %348  ;;  %v353_v44 = vpop.permute.xlu1 %352 }
  0x93   : > { %v370_v45 = vsel %vm368_vm0, %v347_v41, %v349_v43  ;;  %v4960_v41 = vld [vmem:[%s6600_s1 + $0x18] sm:$0xff]  }
  0x94   : > { %398 = vmatprep.subr.bf16.mxu0 %v370_v45  ;;  %2529 = vrot.lane.b32.xlu0 %v5319_v23, %s5115_s11 }
  0x95   : > { %399 = vmatpush1.bf16.msra.mxu0 %v369_v46  ;;  %2531 = vrot.lane.b32.xlu1 %v5322_v24, %s5115_s11 }
  0x96   : > { %v355_v47 = vpop.permute.xlu0 %354  ;;  %v351_v48 = vpop.permute.xlu1 %350 }
  0x97   : > { %v372_v49 = vsel %vm368_vm0, %v353_v44, %v355_v47  ;;  %v371_v50 = vsel %vm368_vm0, %v351_v48, %v353_v44 }
  0x98   : > { %400 = vmatprep.subr.bf16.mxu0 %v372_v49  ;;  %2527 = vrot.lane.b32.xlu0 %v5330_v27, %s5115_s11 }
  0x99   : > { %401 = vmatpush1.bf16.msra.mxu0 %v371_v50  ;;  %2535 = vrot.lane.b32.xlu1 %v5332_v28, %s5115_s11 }
  0x9a   : > { %v359_v51 = vpop.permute.xlu0 %358  ;;  %v361_v52 = vpop.permute.xlu1 %360 }
  0x9b   : > { %v374_v53 = vsel %vm368_vm0, %v359_v51, %v361_v52  ;;  %v4962_v52 = vld [vmem:[%s6600_s1 + $0x48] sm:$0xff]  }
  0x9c   : > { %402 = vmatprep.subr.bf16.mxu0 %v374_v53  ;;  %2537 = vrot.lane.b32.xlu0 %v5339_v29, %s5115_s11 }
  0x9d   : > { %2533 = vrot.lane.b32.xlu1 %v5341_v30, %s5115_s11 }
  0x9e   : > { %v357_v54 = vpop.permute.xlu0 %356  ;;  %v365_v55 = vpop.permute.xlu1 %364 }
  0x9f   : > { %v373_v56 = vsel %vm368_vm0, %v357_v54, %v359_v51 }
  0xa0   : > { %403 = vmatpush1.bf16.msra.mxu0 %v373_v56  ;;  %2541 = vrot.lane.b32.xlu0 %v5349_v33, %s5115_s11 }
  0xa1   : > { %2543 = vrot.lane.b32.xlu1 %v5352_v34, %s5115_s11 }
  0xa2   : > { %v367_v57 = vpop.permute.xlu0 %366  ;;  %v363_v58 = vpop.permute.xlu1 %362 }
  0xa3   : > { %v376_v59 = vsel %vm368_vm0, %v365_v55, %v367_v57  ;;  %v375_v60 = vsel %vm368_vm0, %v363_v58, %v365_v55 }
  0xa4   : > { %404 = vmatprep.subr.bf16.mxu0 %v376_v59  ;;  %2539 = vrot.lane.b32.xlu0 %v5360_v37, %s5115_s11 }
  0xa5   : > { %405 = vmatpush1.bf16.msra.mxu0 %v375_v60  ;;  %2547 = vrot.lane.b32.xlu1 %v5362_v38, %s5115_s11  ;;  %v4963_v60 = vld [vmem:[%s6600_s1 + $0x50] sm:$0xff]  }
  0xa6   : > { %511 = vmatprep.subr.bf16.mxu0 %v5207_v2  ;;  %v616_v62 = vpop.permute.xlu0 %615  ;;  %v618_v63 = vpop.permute.xlu1 %617 }
  0xa8   : > { %4168 = vmatmul.mubr.msk.bf16.vlgmr.msra.gmra.mrb[0].mxu0 %vm385_vm1, %v4941_v61  ;;  %2549 = vrot.lane.b32.xlu0 %v5369_v39, %s5115_s11 }
  0xa9   : > { %440 = vmatprep.mubr.bf16.mxu0 %v5114_v16  ;;  %512 = vmatpush1.bf16.msra.mxu0 %v5209_v3  ;;  %v639_v3 = vsel %vm637_vm2, %v616_v62, %v618_v63  ;;  %v5539_v63 = vld [vmem:[%s6601_s2] sm:$0xff] }
  0xaa   : > { %513 = vmatprep.subr.bf16.mxu0 %v5218_v7  ;;  %2545 = vrot.lane.b32.xlu1 %v5371_v40, %s5115_s11  ;;  %v614_v1 = vpop.permute.xlu0 %613  ;;  %v622_v2 = vpop.permute.xlu1 %621 }
  0xac   : > { %2698 = vrot.lane.b32.xlu0 %v5319_v23, %s5116_s12 }
  0xad   : > { %514 = vmatpush1.bf16.msra.mxu0 %v5226_v11 }
  0xae   : > { %515 = vmatprep.subr.bf16.mxu0 %v5232_v13  ;;  %2700 = vrot.lane.b32.xlu1 %v5322_v24, %s5116_s12  ;;  %v624_v5 = vpop.permute.xlu0 %623  ;;  %v620_v6 = vpop.permute.xlu1 %619  ;;  %v638_v13 = vsel %vm637_vm2, %v614_v1, %v616_v62 }
  0xaf   : > { %v641_v15 = vsel %vm637_vm2, %v622_v2, %v624_v5  ;;  %v5561_v5 = vld [vmem:[%s6601_s2 + $0x10] sm:$0xff] }
  0xb0   : > { %4169 = vmatmul.mubr.msk.bf16.gmra.mrb[4].mxu0 %vm385_vm1, %v4942_v0  ;;  %2696 = vrot.lane.b32.xlu0 %v5330_v27, %s5116_s12  ;;  %v5544_v0 = vld [vmem:[%s6601_s2 + $0x8] sm:$0xff] }
  0xb1   : > { %450 = vmatprep.mubr.bf16.mxu0 %v5114_v16  ;;  %516 = vmatpush1.bf16.msra.mxu0 %v5243_v17 }
  0xb2   : > { %517 = vmatprep.subr.bf16.mxu0 %v5245_v18  ;;  %2704 = vrot.lane.b32.xlu1 %v5332_v28, %s5116_s12  ;;  %v628_v7 = vpop.permute.xlu0 %627  ;;  %v630_v9 = vpop.permute.xlu1 %629  ;;  %v640_v18 = vsel %vm637_vm2, %v620_v6, %v622_v2  ;;  %v4964_v2 = vld [vmem:[%s6600_s1 + $0x58] sm:$0xff]  }
  0xb4   : > { %2706 = vrot.lane.b32.xlu0 %v5339_v29, %s5116_s12 }
  0xb5   : > { %518 = vmatpush1.bf16.msra.mxu0 %v5252_v20  ;;  %v643_v20 = vsel %vm637_vm2, %v628_v7, %v630_v9  ;;  %v4965_v9 = vld [vmem:[%s6600_s1 + $0x60] sm:$0xff]  }
  0xb6   : > { %666 = vmatprep.subr.bf16.mxu0 %v639_v3  ;;  %2702 = vrot.lane.b32.xlu1 %v5341_v30, %s5116_s12  ;;  %v626_v10 = vpop.permute.xlu0 %625  ;;  %v634_v11 = vpop.permute.xlu1 %633 }
  0xb8   : > { %4170 = vmatmul.mubr.msk.bf16.gmra.mrb[8].mxu0 %vm385_vm1, %v4943_v4  ;;  %2710 = vrot.lane.b32.xlu0 %v5349_v33, %s5116_s12  ;;  %v5556_v4 = vld [vmem:[%s6601_s2 + $0x18] sm:$0xff] }
  0xb9   : > { %460 = vmatprep.mubr.bf16.mxu0 %v5114_v16 }
  0xba   : > { %2712 = vrot.lane.b32.xlu1 %v5352_v34, %s5116_s12  ;;  %v636_v14 = vpop.permute.xlu0 %635  ;;  %v632_v17 = vpop.permute.xlu1 %631 }
  0xbb   : > { %v645_v25 = vsel %vm637_vm2, %v634_v11, %v636_v14  ;;  %v5587_v14 = vld [vmem:[%s6601_s2 + $0x38] sm:$0xff] }
  0xbc   : > { %2708 = vrot.lane.b32.xlu0 %v5360_v37, %s5116_s12 }
  0xbe   : > { %2716 = vrot.lane.b32.xlu1 %v5362_v38, %s5116_s12  ;;  %v787_v19 = vpop.permute.xlu0 %786  ;;  %v789_v22 = vpop.permute.xlu1 %788 }
  0xbf   : > { %v810_v31 = vsel %vm808_vm3, %v787_v19, %v789_v22 }
  0xc0   : > { %4171 = vmatmul.mubr.msk.bf16.gmra.mrb[12].mxu0 %vm385_vm1, %v4947_v8  ;;  %2718 = vrot.lane.b32.xlu0 %v5369_v39, %s5116_s12  ;;  %v5574_v8 = vld [vmem:[%s6601_s2 + $0x20] sm:$0xff] }
  0xc1   : > { %543 = vmatprep.mubr.bf16.mxu0 %v5114_v16 }
  0xc2   : > { %2714 = vrot.lane.b32.xlu1 %v5371_v40, %s5116_s12  ;;  %v785_v26 = vpop.permute.xlu0 %784  ;;  %v793_v32 = vpop.permute.xlu1 %792 }
  0xc3   : > { %v809_v46 = vsel %vm808_vm3, %v785_v26, %v787_v19 }
  0xc4   : > { %2867 = vrot.lane.b32.xlu0 %v5319_v23, %s5117_s13 }
  0xc6   : > { %2869 = vrot.lane.b32.xlu1 %v5322_v24, %s5117_s13  ;;  %v642_v24 = vsel %vm637_vm2, %v626_v10, %v628_v7  ;;  %v795_v36 = vpop.permute.xlu0 %794  ;;  %v5569_v7 = vld [vmem:[%s6601_s2 + $0x28] sm:$0xff] }
  0xc7   : > { %v812_v47 = vsel %vm808_vm3, %v793_v32, %v795_v36 }
  0xc8   : > { %4176 = vmatmul.mubr.msk.bf16.vlgmr.msra.gmra.mrb[0].mxu0 %vm385_vm1, %v4952_v12  ;;  %2865 = vrot.lane.b32.xlu0 %v5330_v27, %s5117_s13 }
  0xc9   : > { %667 = vmatpush1.bf16.msra.mxu0 %v638_v13  ;;  %553 = vmatprep.mubr.bf16.mxu0 %v5114_v16 }
  0xca   : > { %668 = vmatprep.subr.bf16.mxu0 %v641_v15  ;;  %2873 = vrot.lane.b32.xlu1 %v5332_v28, %s5117_s13  ;;  %v799_v42 = vpop.permute.xlu0 %798  ;;  %v5592_v15 = vld [vmem:[%s6601_s2 + $0x30] sm:$0xff] }
  0xcc   : > { %2875 = vrot.lane.b32.xlu0 %v5339_v29, %s5117_s13  ;;  %v644_v29 = vsel %vm637_vm2, %v632_v17, %v634_v11 }
  0xcd   : > { %669 = vmatpush1.bf16.msra.mxu0 %v640_v18 }
  0xce   : > { %670 = vmatprep.subr.bf16.mxu0 %v643_v20  ;;  %2871 = vrot.lane.b32.xlu1 %v5341_v30, %s5117_s13  ;;  %v797_v44 = vpop.permute.xlu0 %796  ;;  %v4966_v20 = vld [vmem:[%s6600_s1 + $0x68] sm:$0xff]  }
  0xcf   : > { %v813_v54 = vsel %vm808_vm3, %v797_v44, %v799_v42 }
  0xd0   : > { %4177 = vmatmul.mubr.msk.bf16.gmra.mrb[4].mxu0 %vm385_vm1, %v4957_v21  ;;  %2879 = vrot.lane.b32.xlu0 %v5349_v33, %s5117_s13 }
  0xd1   : > { %563 = vmatprep.mubr.bf16.mxu0 %v5114_v16  ;;  %671 = vmatpush1.bf16.msra.mxu0 %v642_v24 }
  0xd2   : > { %672 = vmatprep.subr.bf16.mxu0 %v645_v25  ;;  %2881 = vrot.lane.b32.xlu1 %v5352_v34, %s5117_s13  ;;  %v791_v34 = vpop.permute.xlu1 %790  ;;  %v807_v48 = vpop.permute.xlu0 %806 }
  0xd3   : > { %v811_v49 = vsel %vm808_vm3, %v791_v34, %v793_v32  ;;  %v4967_v32 = vld [vmem:[%s6600_s1 + $0x70] sm:$0xff]  }
  0xd4   : > { %2877 = vrot.lane.b32.xlu0 %v5360_v37, %s5117_s13 }
  0xd5   : > { %673 = vmatpush1.bf16.msra.mxu0 %v644_v29 }
  0xd6   : > { %837 = vmatprep.subr.bf16.mxu0 %v810_v31  ;;  %2885 = vrot.lane.b32.xlu1 %v5362_v38, %s5117_s13  ;;  %v801_v43 = vpop.permute.xlu1 %800  ;;  %v958_v53 = vpop.permute.xlu0 %957 }
  0xd7   : > { %v814_v50 = vsel %vm808_vm3, %v799_v42, %v801_v43 }
  0xd8   : > { %4178 = vmatmul.mubr.msk.bf16.gmra.mrb[8].mxu0 %vm385_vm1, %v4959_v35  ;;  %2887 = vrot.lane.b32.xlu0 %v5369_v39, %s5117_s13  ;;  %v4961_v39 = vld [vmem:[%s6600_s1 + $0x40] sm:$0xff]  }
  0xd9   : > { %573 = vmatprep.mubr.bf16.mxu0 %v5114_v16 }
  0xda   : > { %2883 = vrot.lane.b32.xlu1 %v5371_v40, %s5117_s13  ;;  %v805_v45 = vpop.permute.xlu1 %804  ;;  %v956_v58 = vpop.permute.xlu0 %955 }
  0xdb   : > { %v816_v55 = vsel %vm808_vm3, %v805_v45, %v807_v48  ;;  %v980_v11 = vsel %vm979_vm4, %v956_v58, %v958_v53  ;;  %v4972_v58 = vld [vmem:[%s6600_s1 + $0x98] sm:$0xff]  }
  0xdc   : > { %1107 = vperm.xlu0 %4847, %v5539_v63  }
  0xde   : > { %v803_v51 = vpop.permute.xlu1 %802  ;;  %v966_v62 = vpop.permute.xlu0 %965  ;;  %1112 = vperm.xlu1 %4848, %v5544_v0  }
  0xdf   : > { %v815_v57 = vsel %vm808_vm3, %v803_v51, %v805_v45  ;;  %v4970_v51 = vld [vmem:[%s6600_s1 + $0x88] sm:$0xff]  }
  0xe0   : > { %4179 = vmatmul.mubr.msk.bf16.gmra.mrb[12].mxu0 %vm385_vm1, %v4960_v41  ;;  %1122 = vperm.xlu0 %4847, %v5556_v4   ;;  %v4968_v41 = vld [vmem:[%s6600_s1 + $0x78] sm:$0xff]  }
  0xe1   : > { %698 = vmatprep.mubr.bf16.mxu0 %v5114_v16 }
  0xe2   : > { %v960_v56 = vpop.permute.xlu1 %959  ;;  %v970_v3 = vpop.permute.xlu0 %969  ;;  %1117 = vperm.xlu1 %4848, %v5561_v5  }
  0xe3   : > { %v981_v59 = vsel %vm979_vm4, %v958_v53, %v960_v56 }
  0xe4   : > { %1132 = vperm.xlu0 %4847, %v5569_v7  }
  0xe6   : > { %v964_v61 = vpop.permute.xlu1 %963  ;;  %v968_v10 = vpop.permute.xlu0 %967  ;;  %1127 = vperm.xlu1 %4848, %v5574_v8  }
  0xe7   : > { %v983_v12 = vsel %vm979_vm4, %v964_v61, %v966_v62  ;;  %v984_v22 = vsel %vm979_vm4, %v968_v10, %v970_v3 }
  0xe8   : > { %4192 = vmatmul.mubr.msk.bf16.vlgmr.msra.gmra.mrb[0].mxu0 %vm385_vm1, %v4961_v39  ;;  %1142 = vperm.xlu0 %4847, %v5587_v14   ;;  %v4969_v39 = vld [vmem:[%s6600_s1 + $0x80] sm:$0xff]  }
  0xe9   : > { %838 = vmatpush1.bf16.msra.mxu0 %v809_v46  ;;  %708 = vmatprep.mubr.bf16.mxu0 %v5114_v16 }
  0xea   : > { %839 = vmatprep.subr.bf16.mxu0 %v812_v47  ;;  %v962_v1 = vpop.permute.xlu1 %961  ;;  %v978_v18 = vpop.permute.xlu0 %977  ;;  %1137 = vperm.xlu1 %4848, %v5592_v15  }
  0xeb   : > { %v982_v17 = vsel %vm979_vm4, %v962_v1, %v964_v61  ;;  %v4975_v1 = vld [vmem:[%s6600_s1 + $0x30] sm:$0xff]  }
  0xed   : > { %840 = vmatpush1.bf16.msra.mxu0 %v811_v49 }
  0xee   : > { %841 = vmatprep.subr.bf16.mxu0 %v814_v50  ;;  %v972_v6 = vpop.permute.xlu1 %971  ;;  %v2264_v24 = vpop.permute.xlu0 %2263 }
  0xef   : > { %v985_v19 = vsel %vm979_vm4, %v970_v3, %v972_v6 }
  0xf0   : > { %4193 = vmatmul.mubr.msk.bf16.gmra.mrb[4].mxu0 %vm385_vm1, %v4962_v52 }
  0xf1   : > { %718 = vmatprep.mubr.bf16.mxu0 %v5114_v16  ;;  %842 = vmatpush1.bf16.msra.mxu0 %v813_v54 }
  0xf2   : > { %843 = vmatprep.subr.bf16.mxu0 %v816_v55  ;;  %v976_v13 = vpop.permute.xlu1 %975  ;;  %v2262_v35 = vpop.permute.xlu0 %2261 }
  0xf3   : > { %v987_v25 = vsel %vm979_vm4, %v976_v13, %v978_v18  ;;  %v2285_v45 = vsel %vm368_vm0, %v2262_v35, %v2264_v24  ;;  %v4978_v18 = vld [vmem:[%s6600_s1 + $0x8] sm:$0xff]  }
  0xf5   : > { %844 = vmatpush1.bf16.msra.mxu0 %v815_v57  ;;  %v4971_v57 = vld [vmem:[%s6600_s1 + $0x90] sm:$0xff]  }
  0xf6   : > { %1008 = vmatprep.subr.bf16.mxu0 %v981_v59  ;;  %v974_v21 = vpop.permute.xlu1 %973  ;;  %v2272_v34 = vpop.permute.xlu0 %2271  ;;  %v4973_v59 = vld [vmem:[%s6600_s1 + $0x20] sm:$0xff]  }
  0xf7   : > { %v986_v29 = vsel %vm979_vm4, %v974_v21, %v976_v13 }
  0xf8   : > { %4194 = vmatmul.mubr.msk.bf16.gmra.mrb[8].mxu0 %vm385_vm1, %v4963_v60  ;;  %v4974_v60 = vld [vmem:[%s6600_s1 + $0x28] sm:$0xff]  }
  0xf9   : > { %728 = vmatprep.mubr.bf16.mxu0 %v5114_v16 }
  0xfa   : > { %v2266_v26 = vpop.permute.xlu1 %2265  ;;  %v2276_v43 = vpop.permute.xlu0 %2275 }
  0xfb   : > { %v2286_v31 = vsel %vm368_vm0, %v2264_v24, %v2266_v26 }
  0xfe   : > { %v2270_v36 = vpop.permute.xlu1 %2269  ;;  %v2274_v46 = vpop.permute.xlu0 %2273 }
  0xff   : > { %v2288_v47 = vsel %vm368_vm0, %v2270_v36, %v2272_v34  ;;  %v2289_v53 = vsel %vm368_vm0, %v2274_v46, %v2276_v43 }
 0x100   : > { %4195 = vmatmul.mubr.msk.bf16.gmra.mrb[12].mxu0 %vm385_vm1, %v4964_v2 }
 0x101   : > { %869 = vmatprep.mubr.bf16.mxu0 %v5114_v16 }
 0x102   : > { %v2268_v42 = vpop.permute.xlu1 %2267  ;;  %v2284_v52 = vpop.permute.xlu0 %2283 }
 0x103   : > { %v2287_v49 = vsel %vm368_vm0, %v2268_v42, %v2270_v36  ;;  %v4980_v36 = vld [vmem:[%s6600_s1 + $0x18] sm:$0xff]   ;;  %v4981_v42 = vld [vmem:[%s6600_s1 + $0x40] sm:$0xff]  }
 0x106   : > { %v2278_v44 = vpop.permute.xlu1 %2277 }
 0x107   : > { %v2290_v50 = vsel %vm368_vm0, %v2276_v43, %v2278_v44 }
 0x108   : > { %4208 = vmatmul.mubr.msk.bf16.vlgmr.msra.gmra.mrb[0].mxu0 %vm385_vm1, %v4965_v9 }
 0x109   : > { %1009 = vmatpush1.bf16.msra.mxu0 %v980_v11  ;;  %879 = vmatprep.mubr.bf16.mxu0 %v5114_v16 }
 0x10a   : > { %1010 = vmatprep.subr.bf16.mxu0 %v983_v12  ;;  %v2282_v48 = vpop.permute.xlu1 %2281 }
 0x10b   : > { %v2292_v55 = vsel %vm368_vm0, %v2282_v48, %v2284_v52 }
 0x10d   : > { %1011 = vmatpush1.bf16.msra.mxu0 %v982_v17 }
 0x10e   : > { %1012 = vmatprep.subr.bf16.mxu0 %v985_v19  ;;  %v2280_v54 = vpop.permute.xlu1 %2279 }
 0x10f   : > { %v2291_v56 = vsel %vm368_vm0, %v2280_v54, %v2282_v48 }
 0x110   : > { %4209 = vmatmul.mubr.msk.bf16.gmra.mrb[4].mxu0 %vm385_vm1, %v4966_v20 }
 0x111   : > { %889 = vmatprep.mubr.bf16.mxu0 %v5114_v16  ;;  %1013 = vmatpush1.bf16.msra.mxu0 %v984_v22 }
 0x112   : > { %1014 = vmatprep.subr.bf16.mxu0 %v987_v25  ;;  %v2532_v61 = vpop.permute.xlu1 %2531 }
 0x115   : > { %1015 = vmatpush1.bf16.msra.mxu0 %v986_v29  ;;  %v4979_v29 = vld [vmem:[%s6600_s1 + $0x10] sm:$0xff]  }
 0x116   : > { %2313 = vmatprep.subr.bf16.mxu0 %v2286_v31 }
 0x118   : > { %4210 = vmatmul.mubr.msk.bf16.gmra.mrb[8].mxu0 %vm385_vm1, %v4967_v32 }
 0x119   : > { %899 = vmatprep.mubr.bf16.mxu0 %v5114_v16 }
 0x120   : > { %4211 = vmatmul.mubr.msk.bf16.gmra.mrb[12].mxu0 %vm385_vm1, %v4968_v41 }
 0x121   : > { %1040 = vmatprep.mubr.bf16.mxu0 %v5114_v16 }
 0x128   : > { %4224 = vmatmul.mubr.msk.bf16.vlgmr.msra.gmra.mrb[0].mxu0 %vm385_vm1, %v4969_v39 }
 0x129   : > { %1050 = vmatprep.mubr.bf16.mxu0 %v5114_v16  ;;  %2314 = vmatpush1.bf16.msra.mxu0 %v2285_v45 }
 0x12a   : > { %2315 = vmatprep.subr.bf16.mxu0 %v2288_v47 }
 0x12d   : > { %2316 = vmatpush1.bf16.msra.mxu0 %v2287_v49  ;;  %v4982_v49 = vld [vmem:[%s6600_s1 + $0x48] sm:$0xff]  }
 0x12e   : > { %2317 = vmatprep.subr.bf16.mxu0 %v2290_v50 }
 0x130   : > { %4225 = vmatmul.mubr.msk.bf16.gmra.mrb[4].mxu0 %vm385_vm1, %v4970_v51 }
 0x131   : > { %1060 = vmatprep.mubr.bf16.mxu0 %v5114_v16  ;;  %2318 = vmatpush1.bf16.msra.mxu0 %v2289_v53 }
 0x132   : > { %2319 = vmatprep.subr.bf16.mxu0 %v2292_v55 }
 0x135   : > { %2320 = vmatpush1.bf16.msra.mxu0 %v2291_v56 }
 0x136   : > { %2426 = vmatprep.subr.bf16.mxu0 %v5319_v23  ;;  %v2530_v23 = vpop.permute.xlu0 %2529 }
 0x138   : > { %4226 = vmatmul.mubr.msk.bf16.gmra.mrb[8].mxu0 %vm385_vm1, %v4971_v57  ;;  %v4983_v57 = vld [vmem:[%s6600_s1 + $0x50] sm:$0xff]  }
 0x139   : > { %1070 = vmatprep.mubr.bf16.mxu0 %v5114_v16 }
 0x13a   : > { %v2528_v62 = vpop.permute.xlu0 %2527 }
 0x13b   : > { %v2551_v9 = vsel %vm637_vm2, %v2528_v62, %v2530_v23 }
 0x140   : > { %4227 = vmatmul.mubr.msk.bf16.gmra.mrb[12].mxu0 %vm385_vm1, %v4972_v58 }
 0x141   : > { %2345 = vmatprep.mubr.bf16.mxu0 %v5114_v16 }
 0x148   : > { %4340 = vmatmul.mubr.msk.bf16.vlgmr.msra.gmra.mrb[16].mxu0 %vm385_vm1, %v4973_v59 }
 0x149   : > { %2355 = vmatprep.mubr.bf16.mxu0 %v5114_v16  ;;  %2427 = vmatpush1.bf16.msra.mxu0 %v5330_v27  ;;  %v2536_v27 = vpop.permute.xlu1 %2535 }
 0x14a   : > { %2428 = vmatprep.subr.bf16.mxu0 %v5332_v28  ;;  %v2552_v28 = vsel %vm637_vm2, %v2530_v23, %v2532_v61 }
 0x14d   : > { %2429 = vmatpush1.bf16.msra.mxu0 %v5341_v30  ;;  %v2538_v30 = vpop.permute.xlu0 %2537 }
 0x14e   : > { %2430 = vmatprep.subr.bf16.mxu0 %v5349_v33  ;;  %v2534_v33 = vpop.permute.xlu1 %2533  ;;  %v2554_v10 = vsel %vm637_vm2, %v2536_v27, %v2538_v30 }
 0x14f   : > { %v2553_v12 = vsel %vm637_vm2, %v2534_v33, %v2536_v27 }
 0x150   : > { %4341 = vmatmul.mubr.msk.bf16.gmra.mrb[20].mxu0 %vm385_vm1, %v4974_v60  ;;  %v4984_v60 = vld [vmem:[%s6600_s1 + $0x58] sm:$0xff]  }
 0x151   : > { %2365 = vmatprep.mubr.bf16.mxu0 %v5114_v16  ;;  %2431 = vmatpush1.bf16.msra.mxu0 %v5360_v37  ;;  %v4976_v37 = vld [vmem:[%s6600_s1 + $0x38] sm:$0xff]  }
 0x152   : > { %2432 = vmatprep.subr.bf16.mxu0 %v5362_v38  ;;  %v2542_v38 = vpop.permute.xlu0 %2541  ;;  %v2544_v2 = vpop.permute.xlu1 %2543 }
 0x153   : > { %v2556_v13 = vsel %vm637_vm2, %v2542_v38, %v2544_v2 }
 0x155   : > { %2433 = vmatpush1.bf16.msra.mxu0 %v5371_v40  ;;  %v4977_v40 = vld [vmem:[%s6600_s1] sm:$0xff]  }
 0x156   : > { %2579 = vmatprep.subr.bf16.mxu0 %v2552_v28  ;;  %v2540_v3 = vpop.permute.xlu0 %2539  ;;  %v2548_v6 = vpop.permute.xlu1 %2547  ;;  %v4985_v28 = vld [vmem:[%s6600_s1 + $0x60] sm:$0xff]  }
 0x157   : > { %v2555_v20 = vsel %vm637_vm2, %v2540_v3, %v2542_v38  ;;  %v4986_v3 = vld [vmem:[%s6600_s1 + $0x68] sm:$0xff]  }
 0x158   : > { %4342 = vmatmul.mubr.msk.bf16.gmra.mrb[24].mxu0 %vm385_vm1, %v4975_v1 }
 0x159   : > { %2375 = vmatprep.mubr.bf16.mxu0 %v5114_v16 }
 0x15a   : > { %v2550_v11 = vpop.permute.xlu0 %2549  ;;  %v2546_v17 = vpop.permute.xlu1 %2545 }
 0x15b   : > { %v2558_v21 = vsel %vm637_vm2, %v2548_v6, %v2550_v11  ;;  %v2557_v24 = vsel %vm637_vm2, %v2546_v17, %v2548_v6  ;;  %v4989_v17 = vld [vmem:[%s6600_s1 + $0x80] sm:$0xff]  }
 0x15e   : > { %v2699_v19 = vpop.permute.xlu0 %2698  ;;  %v2701_v22 = vpop.permute.xlu1 %2700 }
 0x15f   : > { %v2721_v26 = vsel %vm808_vm3, %v2699_v19, %v2701_v22 }
 0x160   : > { %4343 = vmatmul.mubr.msk.bf16.gmra.mrb[28].mxu0 %vm385_vm1, %v4976_v37 }
 0x161   : > { %2458 = vmatprep.mubr.bf16.mxu0 %v5114_v16 }
 0x162   : > { %v2697_v25 = vpop.permute.xlu0 %2696  ;;  %v2705_v31 = vpop.permute.xlu1 %2704 }
 0x163   : > { %v2720_v44 = vsel %vm808_vm3, %v2697_v25, %v2699_v19  ;;  %v4991_v19 = vld [vmem:[%s6600_s1 + $0x90] sm:$0xff]  }
 0x166   : > { %v2707_v32 = vpop.permute.xlu0 %2706  ;;  %v2703_v35 = vpop.permute.xlu1 %2702 }
 0x167   : > { %v2723_v39 = vsel %vm808_vm3, %v2705_v31, %v2707_v32  ;;  %v2722_v46 = vsel %vm808_vm3, %v2703_v35, %v2705_v31 }
 0x168   : > { %4348 = vmatmul.mubr.msk.bf16.vlgmr.msra.gmra.mrb[16].mxu0 %vm385_vm1, %v4977_v40 }
 0x169   : > { %2468 = vmatprep.mubr.bf16.mxu0 %v5114_v16  ;;  %2580 = vmatpush1.bf16.msra.mxu0 %v2551_v9 }
 0x16a   : > { %2581 = vmatprep.subr.bf16.mxu0 %v2554_v10  ;;  %v2711_v34 = vpop.permute.xlu0 %2710  ;;  %v2713_v41 = vpop.permute.xlu1 %2712 }
 0x16b   : > { %v2725_v48 = vsel %vm808_vm3, %v2711_v34, %v2713_v41 }
 0x16d   : > { %2582 = vmatpush1.bf16.msra.mxu0 %v2553_v12  ;;  %v4987_v12 = vld [vmem:[%s6600_s1 + $0x70] sm:$0xff]  }
 0x16e   : > { %2583 = vmatprep.subr.bf16.mxu0 %v2556_v13  ;;  %v2709_v43 = vpop.permute.xlu0 %2708  ;;  %v2717_v45 = vpop.permute.xlu1 %2716  ;;  %v4988_v13 = vld [vmem:[%s6600_s1 + $0x78] sm:$0xff]  }
 0x16f   : > { %v2724_v51 = vsel %vm808_vm3, %v2709_v43, %v2711_v34 }
 0x170   : > { %4349 = vmatmul.mubr.msk.bf16.gmra.mrb[20].mxu0 %vm385_vm1, %v4978_v18  ;;  %v4990_v18 = vld [vmem:[%s6600_s1 + $0x88] sm:$0xff]  }
 0x171   : > { %2478 = vmatprep.mubr.bf16.mxu0 %v5114_v16  ;;  %2584 = vmatpush1.bf16.msra.mxu0 %v2555_v20  ;;  %v4992_v20 = vld [vmem:[%s6600_s1 + $0x98] sm:$0xff]  }
 0x172   : > { %2585 = vmatprep.subr.bf16.mxu0 %v2558_v21  ;;  %v2719_v47 = vpop.permute.xlu0 %2718  ;;  %v2715_v50 = vpop.permute.xlu1 %2714  ;;  %v230_v21 = vlaneseq }
 0x173   : > { %v2727_v53 = vsel %vm808_vm3, %v2717_v45, %v2719_v47  ;;  %v2726_v55 = vsel %vm808_vm3, %v2715_v50, %v2717_v45 }
 0x174   : > { %v5776_v22 = vand.u32 127, %v230_v21 }
 0x175   : > { %2586 = vmatpush1.bf16.msra.mxu0 %v2557_v24 }
 0x176   : > { %2748 = vmatprep.subr.bf16.mxu0 %v2721_v26  ;;  %v2868_v52 = vpop.permute.xlu0 %2867  ;;  %v2870_v54 = vpop.permute.xlu1 %2869  ;;  %v5779_v31 = vadd.s32 128, %v5776_v22  ;;  %vm233_vm5 = vcmp.ge.s32.totalorder %v5776_v22, 1  ;;  %v5001_v22 = vld [vmem:[%s6602_s3 + $0x40] sm:$0xff]  }
 0x177   : > { %v2890_v56 = vsel %vm979_vm4, %v2868_v52, %v2870_v54  ;;  %vm5915_vm8 = vmpackc.low %vm233_vm5, %vm233_vm5 }
 0x178   : > { %4350 = vmatmul.mubr.msk.bf16.gmra.mrb[24].mxu0 %vm385_vm1, %v4979_v29  ;;  %vm236_vm6 = vcmp.lt.s32.totalorder %v5779_v31, 255 }
 0x179   : > { %2488 = vmatprep.mubr.bf16.mxu0 %v5114_v16  ;;  %vm5901_vm7 = vmpackc.low %vm236_vm6, %vm236_vm6 }
 0x17a   : > { %v2866_v58 = vpop.permute.xlu0 %2865  ;;  %v2874_v59 = vpop.permute.xlu1 %2873 }
 0x17b   : > { %v2889_v1 = vsel %vm979_vm4, %v2866_v58, %v2868_v52 }
 0x17e   : > { %v2876_v23 = vpop.permute.xlu0 %2875  ;;  %v2872_v61 = vpop.permute.xlu1 %2871 }
 0x17f   : > { %v2892_v33 = vsel %vm979_vm4, %v2874_v59, %v2876_v23  ;;  %v2891_v38 = vsel %vm979_vm4, %v2872_v61, %v2874_v59 }
 0x180   : > { %4351 = vmatmul.mubr.msk.bf16.gmra.mrb[28].mxu0 %vm385_vm1, %v4980_v36 }
 0x181   : > { %2611 = vmatprep.mubr.bf16.mxu0 %v5114_v16 }
 0x182   : > { %v2880_v62 = vpop.permute.xlu0 %2879  ;;  %v2882_v27 = vpop.permute.xlu1 %2881 }
 0x183   : > { %v2894_v2 = vsel %vm979_vm4, %v2880_v62, %v2882_v27 }
 0x186   : > { %v2878_v30 = vpop.permute.xlu0 %2877  ;;  %v2886_v37 = vpop.permute.xlu1 %2885 }
 0x187   : > { %v2893_v6 = vsel %vm979_vm4, %v2878_v30, %v2880_v62 }
 0x188   : > { %4364 = vmatmul.mubr.msk.bf16.vlgmr.msra.gmra.mrb[16].mxu0 %vm385_vm1, %v4981_v42 }
 0x189   : > { %2621 = vmatprep.mubr.bf16.mxu0 %v5114_v16  ;;  %2749 = vmatpush1.bf16.msra.mxu0 %v2720_v44 }
 0x18a   : > { %2750 = vmatprep.subr.bf16.mxu0 %v2723_v39  ;;  %v2888_v40 = vpop.permute.xlu0 %2887  ;;  %v2884_v9 = vpop.permute.xlu1 %2883 }
 0x18b   : > { %v2896_v10 = vsel %vm979_vm4, %v2886_v37, %v2888_v40  ;;  %v2895_v11 = vsel %vm979_vm4, %v2884_v9, %v2886_v37 }
 0x18d   : > { %2751 = vmatpush1.bf16.msra.mxu0 %v2722_v46 }
 0x18e   : > { %2752 = vmatprep.subr.bf16.mxu0 %v2725_v48  ;;  %v1108_v24 = vpop.permute.xlu0 %1107  ;;  %v1113_v26 = vpop.permute.xlu1 %1112 }
 0x190   : > { %4365 = vmatmul.mubr.msk.bf16.gmra.mrb[20].mxu0 %vm385_vm1, %v4982_v49 }
 0x191   : > { %2631 = vmatprep.mubr.bf16.mxu0 %v5114_v16  ;;  %2753 = vmatpush1.bf16.msra.mxu0 %v2724_v51 }
 0x192   : > { %2754 = vmatprep.subr.bf16.mxu0 %v2727_v53  ;;  %v1118_v46 = vpop.permute.xlu1 %1117  ;;  %v1123_v58 = vpop.permute.xlu0 %1122 }
 0x195   : > { %2755 = vmatpush1.bf16.msra.mxu0 %v2726_v55 }
 0x196   : > { %2917 = vmatprep.subr.bf16.mxu0 %v2890_v56  ;;  %v1128_v9 = vpop.permute.xlu1 %1127 }
 0x198   : > { %4366 = vmatmul.mubr.msk.bf16.gmra.mrb[24].mxu0 %vm385_vm1, %v4983_v57 }
 0x199   : > { %2641 = vmatprep.mubr.bf16.mxu0 %v5114_v16 }
 0x1a0   : > { %4367 = vmatmul.mubr.msk.bf16.gmra.mrb[28].mxu0 %vm385_vm1, %v4984_v60 }
 0x1a1   : > { %2780 = vmatprep.mubr.bf16.mxu0 %v5114_v16 }
 0x1a8   : > { %4380 = vmatmul.mubr.msk.bf16.vlgmr.msra.gmra.mrb[16].mxu0 %vm385_vm1, %v4985_v28 }
 0x1a9   : > { %2790 = vmatprep.mubr.bf16.mxu0 %v5114_v16  ;;  %2918 = vmatpush1.bf16.msra.mxu0 %v2889_v1 }
 0x1aa   : > { %2919 = vmatprep.subr.bf16.mxu0 %v2892_v33 }
 0x1ad   : > { %2920 = vmatpush1.bf16.msra.mxu0 %v2891_v38 }
 0x1ae   : > { %2921 = vmatprep.subr.bf16.mxu0 %v2894_v2 }
 0x1b0   : > { %4381 = vmatmul.mubr.msk.bf16.gmra.mrb[20].mxu0 %vm385_vm1, %v4986_v3 }
 0x1b1   : > { %2800 = vmatprep.mubr.bf16.mxu0 %v5114_v16  ;;  %2922 = vmatpush1.bf16.msra.mxu0 %v2893_v6 }
 0x1b2   : > { %2923 = vmatprep.subr.bf16.mxu0 %v2896_v10 }
 0x1b5   : > { %2924 = vmatpush1.bf16.msra.mxu0 %v2895_v11 }
 0x1b8   : > { %4382 = vmatmul.mubr.msk.bf16.gmra.mrb[24].mxu0 %vm385_vm1, %v4987_v12 }
 0x1b9   : > { %2810 = vmatprep.mubr.bf16.mxu0 %v5114_v16 }
 0x1c0   : > { %4383 = vmatmul.mubr.msk.bf16.gmra.mrb[28].mxu0 %vm385_vm1, %v4988_v13 }
 0x1c1   : > { %2949 = vmatprep.mubr.bf16.mxu0 %v5114_v16 }
 0x1c8   : > { %4396 = vmatmul.mubr.msk.bf16.vlgmr.msra.gmra.mrb[16].mxu0 %vm385_vm1, %v4989_v17  ;;  %v1133_v17 = vpop.permute.xlu0 %1132 }
 0x1c9   : > { %2959 = vmatprep.mubr.bf16.mxu0 %v5114_v16 }
 0x1d0   : > { %4397 = vmatmul.mubr.msk.bf16.gmra.mrb[20].mxu0 %vm385_vm1, %v4990_v18 }
 0x1d1   : > { %2969 = vmatprep.mubr.bf16.mxu0 %v5114_v16 }
 0x1d8   : > { %4398 = vmatmul.mubr.msk.bf16.gmra.mrb[24].mxu0 %vm385_vm1, %v4991_v19 }
 0x1d9   : > { %2979 = vmatprep.mubr.bf16.mxu0 %v5114_v16 }
 0x1e0   : > { %4399 = vmatmul.mubr.msk.bf16.gmra.mrb[28].mxu0 %vm385_vm1, %v4992_v20 }
 0x1fb   : > { %v1042_v25 = vpop.f32.mrb[0].mxu0 }
 0x1fc   : > { %v1145_v29 = vadd.f32 %v1108_v24, %v1042_v25  ;;  %v1044_v32 = vpop.f32.mrb[1].mxu0 }
 0x1fd   : > { %v1146_v35 = vadd.f32 %v1108_v24, %v1044_v32  ;;  %v1046_v36 = vpop.f32.mrb[2].mxu0 }
 0x1fe   : > { %v1161_v34 = vmax.f32 %v1145_v29, 0.0  ;;  %v1147_v41 = vadd.f32 %v1113_v26, %v1046_v36  ;;  %v1048_v42 = vpop.f32.mrb[3].mxu0 }
 0x1ff   : > { %v1162_v43 = vmax.f32 %v1146_v35, 0.0  ;;  %v1148_v44 = vadd.f32 %v1113_v26, %v1048_v42 }
 0x200   : > { %v1163_v39 = vmax.f32 %v1147_v41, 0.0  ;;  %v1177_v47 = vsel %vm233_vm5, %v1161_v34, 0.0  ;;  %v1138_v41 = vpop.permute.xlu1 %1137 }
 0x201   : > { %v1164_v45 = vmax.f32 %v1148_v44, 0.0  ;;  %v1178_v50 = vsel %vm236_vm6, %v1162_v43, 0.0 }
 0x202   : > { %v1179_v48 = vsel %vm233_vm5, %v1163_v39, 0.0  ;;  %v5787_v49 = vpack.c.bf16 %v1163_v39, %v1161_v34 }
 0x203   : > { %v5791_v51 = vpack.c.bf16 %v1179_v48, %v1177_v47  ;;  %v1180_v52 = vsel %vm236_vm6, %v1164_v45, 0.0  ;;  %v5795_v53 = vpack.c.bf16 %v1164_v45, %v1162_v43  ;;  %v1052_v54 = vpop.f32.mrb[4].mxu0 }
 0x204   : > { %v5797_v55 = vpack.c.bf16 %v1180_v52, %v1178_v50  ;;  %v1149_v56 = vadd.f32 %v1118_v46, %v1052_v54  ;;  %v1054_v57 = vpop.f32.mrb[5].mxu0  ;;  %v1143_v50 = vpop.permute.xlu0 %1142 }
 0x205   : > { %v1150_v59 = vadd.f32 %v1118_v46, %v1054_v57  ;;  %v1056_v23 = vpop.f32.mrb[6].mxu0  ;;  %1262 = vrot.lane.b32.xlu1 %v5791_v51, %s5113_s10 }
 0x206   : > { %v1165_v60 = vmax.f32 %v1149_v56, 0.0  ;;  %v1151_v61 = vadd.f32 %v1123_v58, %v1056_v23  ;;  %v1058_v62 = vpop.f32.mrb[7].mxu0  ;;  %1264 = vrot.lane.b32.xlu0 %v5797_v55, %s5113_s10 }
 0x207   : > { %v1166_v27 = vmax.f32 %v1150_v59, 0.0  ;;  %v1152_v28 = vadd.f32 %v1123_v58, %v1058_v62 }
 0x208   : > { %v1167_v1 = vmax.f32 %v1151_v61, 0.0  ;;  %v1181_v33 = vsel %vm233_vm5, %v1165_v60, 0.0 }
 0x209   : > { %v1168_v30 = vmax.f32 %v1152_v28, 0.0  ;;  %v1182_v2 = vsel %vm236_vm6, %v1166_v27, 0.0 }
 0x20a   : > { %v1183_v37 = vsel %vm233_vm5, %v1167_v1, 0.0  ;;  %v5807_v38 = vpack.c.bf16 %v1167_v1, %v1165_v60 }
 0x20b   : > { %v5811_v3 = vpack.c.bf16 %v1183_v37, %v1181_v33  ;;  %v1184_v40 = vsel %vm236_vm6, %v1168_v30, 0.0  ;;  %v5815_v6 = vpack.c.bf16 %v1168_v30, %v1166_v27  ;;  %v1062_v10 = vpop.f32.mrb[8].mxu0 }
 0x20c   : > { %v5817_v11 = vpack.c.bf16 %v1184_v40, %v1182_v2  ;;  %v1153_v12 = vadd.f32 %v1128_v9, %v1062_v10  ;;  %v1064_v13 = vpop.f32.mrb[9].mxu0  ;;  %v4993_v10 = vld [vmem:[%s6602_s3 + $0x20] sm:$0xff]  }
 0x20d   : > { %v1154_v18 = vadd.f32 %v1128_v9, %v1064_v13  ;;  %v1066_v19 = vpop.f32.mrb[10].mxu0  ;;  %1266 = vrot.lane.b32.xlu1 %v5811_v3, %s5113_s10 }
 0x20e   : > { %v1169_v20 = vmax.f32 %v1153_v12, 0.0  ;;  %v1155_v21 = vadd.f32 %v1133_v17, %v1066_v19  ;;  %v1068_v24 = vpop.f32.mrb[11].mxu0  ;;  %1268 = vrot.lane.b32.xlu0 %v5817_v11, %s5113_s10 }
 0x20f   : > { %v1170_v25 = vmax.f32 %v1154_v18, 0.0  ;;  %v1156_v26 = vadd.f32 %v1133_v17, %v1068_v24 }
 0x210   : > { %v1171_v29 = vmax.f32 %v1155_v21, 0.0  ;;  %v1185_v35 = vsel %vm233_vm5, %v1169_v20, 0.0 }
 0x211   : > { %v1172_v32 = vmax.f32 %v1156_v26, 0.0  ;;  %v1186_v42 = vsel %vm236_vm6, %v1170_v25, 0.0 }
 0x212   : > { %v1187_v36 = vsel %vm233_vm5, %v1171_v29, 0.0  ;;  %v5827_v34 = vpack.c.bf16 %v1171_v29, %v1169_v20  ;;  %v4995_v20 = vld [vmem:[%s6602_s3 + $0x30] sm:$0xff]  }
 0x213   : > { %v1197_v43 = vpack.c.bf16 %v1187_v36, %v1185_v35  ;;  %v1188_v44 = vsel %vm236_vm6, %v1172_v32, 0.0  ;;  %v5833_v39 = vpack.c.bf16 %v1172_v32, %v1170_v25  ;;  %v1072_v45 = vpop.f32.mrb[12].mxu0  ;;  %v4996_v35 = vld [vmem:[%s6602_s3 + $0x38] sm:$0xff]  }
 0x214   : > { %v1198_v46 = vpack.c.bf16 %v1188_v44, %v1186_v42  ;;  %v1157_v47 = vadd.f32 %v1138_v41, %v1072_v45  ;;  %v1074_v48 = vpop.f32.mrb[13].mxu0 }
 0x215   : > { %v1158_v52 = vadd.f32 %v1138_v41, %v1074_v48  ;;  %v1076_v54 = vpop.f32.mrb[14].mxu0  ;;  %1270 = vrot.lane.b32.xlu1 %v1197_v43, %s5113_s10  ;;  %v4997_v48 = vld [vmem:[%s6602_s3] sm:$0xff]  }
 0x216   : > { %v1173_v56 = vmax.f32 %v1157_v47, 0.0  ;;  %v1159_v57 = vadd.f32 %v1143_v50, %v1076_v54  ;;  %v1078_v58 = vpop.f32.mrb[15].mxu0  ;;  %1272 = vrot.lane.b32.xlu0 %v1198_v46, %s5113_s10 }
 0x217   : > { %v1174_v59 = vmax.f32 %v1158_v52, 0.0  ;;  %v1160_v23 = vadd.f32 %v1143_v50, %v1078_v58 }
 0x218   : > { %v1175_v60 = vmax.f32 %v1159_v57, 0.0  ;;  %v1189_v62 = vsel %vm233_vm5, %v1173_v56, 0.0 }
 0x219   : > { %v1176_v61 = vmax.f32 %v1160_v23, 0.0  ;;  %v1190_v1 = vsel %vm236_vm6, %v1174_v59, 0.0 }
 0x21a   : > { %v1191_v27 = vsel %vm233_vm5, %v1175_v60, 0.0  ;;  %v5841_v28 = vpack.c.bf16 %v1175_v60, %v1173_v56 }
 0x21b   : > { %v1199_v30 = vpack.c.bf16 %v1191_v27, %v1189_v62  ;;  %v1192_v33 = vsel %vm236_vm6, %v1176_v61, 0.0  ;;  %v5847_v37 = vpack.c.bf16 %v1176_v61, %v1174_v59 }
 0x21c   : > { %v1200_v2 = vpack.c.bf16 %v1192_v33, %v1190_v1 }
 0x21d   : > { %1274 = vrot.lane.b32.xlu1 %v1199_v30, %s5113_s10 }
 0x21e   : > { %1276 = vrot.lane.b32.xlu0 %v1200_v2, %s5113_s10 }
 0x221   : > { %1509 = vrot.lane.b32.xlu1 %v5791_v51, %s5115_s11 }
 0x222   : > { %1511 = vrot.lane.b32.xlu0 %v5797_v55, %s5115_s11 }
 0x225   : > { %1513 = vrot.lane.b32.xlu1 %v5811_v3, %s5115_s11 }
 0x226   : > { %1515 = vrot.lane.b32.xlu0 %v5817_v11, %s5115_s11 }
 0x229   : > { %1517 = vrot.lane.b32.xlu1 %v1197_v43, %s5115_s11 }
 0x22a   : > { %1519 = vrot.lane.b32.xlu0 %v1198_v46, %s5115_s11 }
 0x22d   : > { %1521 = vrot.lane.b32.xlu1 %v1199_v30, %s5115_s11 }
 0x22e   : > { %1523 = vrot.lane.b32.xlu0 %v1200_v2, %s5115_s11 }
 0x231   : > { %3016 = vperm.xlu1 %4848, %v5539_v63  }
 0x232   : > { %3021 = vperm.xlu0 %4847, %v5544_v0  }
 0x235   : > { %3026 = vperm.xlu1 %4848, %v5561_v5  }
 0x236   : > { %3031 = vperm.xlu0 %4847, %v5556_v4  }
 0x239   : > { %1667 = vrot.lane.b32.xlu1 %v5791_v51, %s5116_s12 }
 0x23a   : > { %1669 = vrot.lane.b32.xlu0 %v5797_v55, %s5116_s12 }
 0x23d   : > { %3036 = vperm.xlu1 %4848, %v5574_v8  }
 0x23e   : > { %3041 = vperm.xlu0 %4847, %v5569_v7  }
 0x241   : > { %1671 = vrot.lane.b32.xlu1 %v5811_v3, %s5116_s12 }
 0x242   : > { %1673 = vrot.lane.b32.xlu0 %v5817_v11, %s5116_s12 }
 0x245   : > { %3046 = vperm.xlu1 %4848, %v5592_v15  }
 0x246   : > { %3051 = vperm.xlu0 %4847, %v5587_v14  }
 0x249   : > { %1675 = vrot.lane.b32.xlu1 %v1197_v43, %s5116_s12 }
 0x24a   : > { %1677 = vrot.lane.b32.xlu0 %v1198_v46, %s5116_s12 }
 0x24d   : > { %1679 = vrot.lane.b32.xlu1 %v1199_v30, %s5116_s12 }
 0x24e   : > { %1681 = vrot.lane.b32.xlu0 %v1200_v2, %s5116_s12 }
 0x251   : > { %1825 = vrot.lane.b32.xlu1 %v5791_v51, %s5117_s13 }
 0x252   : > { %1827 = vrot.lane.b32.xlu0 %v5797_v55, %s5117_s13 }
 0x255   : > { %1829 = vrot.lane.b32.xlu1 %v5811_v3, %s5117_s13 }
 0x256   : > { %1831 = vrot.lane.b32.xlu0 %v5817_v11, %s5117_s13  ;;  %v5017_v11 = vld [vmem:[%s6602_s3] sm:$0xff]  }
 0x259   : > { %1833 = vrot.lane.b32.xlu1 %v1197_v43, %s5117_s13 }
 0x25a   : > { %1835 = vrot.lane.b32.xlu0 %v1198_v46, %s5117_s13 }
 0x25d   : > { %1837 = vrot.lane.b32.xlu1 %v1199_v30, %s5117_s13 }
 0x25e   : > { %1839 = vrot.lane.b32.xlu0 %v1200_v2, %s5117_s13 }
 0x277   : > { %v1263_v63 = vpop.permute.xlu1 %1262 }
 0x278   : > { %v1265_v0 = vpop.permute.xlu0 %1264 }
 0x279   : > { %1302 = vmatprep.subr.bf16.mxu1 %v1265_v0  ;;  %v1278_v4 = vsel %vm368_vm0, %v1263_v63, %v1265_v0 }
 0x27a   : > { %1303 = vmatpush1.bf16.msra.mxu1 %v1278_v4 }
 0x27f   : > { %v1267_v5 = vpop.permute.xlu1 %1266 }
 0x280   : > { %v1269_v7 = vpop.permute.xlu0 %1268 }
 0x281   : > { %1304 = vmatprep.subr.bf16.mxu1 %v1269_v7  ;;  %v1279_v8 = vsel %vm368_vm0, %v1267_v5, %v1269_v7 }
 0x282   : > { %1305 = vmatpush1.bf16.msra.mxu1 %v1279_v8 }
 0x287   : > { %v1271_v14 = vpop.permute.xlu1 %1270 }
 0x288   : > { %v1273_v15 = vpop.permute.xlu0 %1272 }
 0x289   : > { %1306 = vmatprep.subr.bf16.mxu1 %v1273_v15  ;;  %v1280_v51 = vsel %vm368_vm0, %v1271_v14, %v1273_v15 }
 0x28a   : > { %1307 = vmatpush1.bf16.msra.mxu1 %v1280_v51 }
 0x28f   : > { %v1275_v55 = vpop.permute.xlu1 %1274 }
 0x290   : > { %v1277_v3 = vpop.permute.xlu0 %1276 }
 0x291   : > { %1308 = vmatprep.subr.bf16.mxu1 %v1277_v3  ;;  %v1281_v9 = vsel %vm368_vm0, %v1275_v55, %v1277_v3 }
 0x292   : > { %1309 = vmatpush1.bf16.msra.mxu1 %v1281_v9 }
 0x293   : > { %4498 = vmatprep.subr.msk.bf16.mxu1 %vm5901_vm7, %v5795_v53  ;;  %v4994_v53 = vld [vmem:[%s6602_s3 + $0x28] sm:$0xff]   ;;  %v1510_v12 = vpop.permute.xlu1 %1509 }
 0x294   : > { %v1512_v13 = vpop.permute.xlu0 %1511 }
 0x295   : > { %4240 = vmatmul.mubr.msk.bf16.vlgmr.msra.gmra.mrb[0].mxu1 %vm385_vm1, %v4993_v10  ;;  %v1525_v58 = vsel %vm637_vm2, %v1510_v12, %v1512_v13  ;;  %v4998_v10 = vld [vmem:[%s6602_s3 + $0x8] sm:$0xff]  }
 0x296   : > { %4501 = vmatpush1.bf16.msk.msra.mxu1 %vm5915_vm8, %v5787_v49  ;;  %1344 = vmatprep.mubr.bf16.mxu1 %v5114_v16 }
 0x297   : > { %4504 = vmatprep.subr.msk.bf16.mxu1 %vm5901_vm7, %v5815_v6 }
 0x298   : > { %v1516_v19 = vpop.permute.xlu0 %1515 }
 0x29a   : > { %4507 = vmatpush1.bf16.msk.msra.mxu1 %vm5915_vm8, %v5807_v38  ;;  %v1514_v38 = vpop.permute.xlu1 %1513 }
 0x29b   : > { %4510 = vmatprep.subr.msk.bf16.mxu1 %vm5901_vm7, %v5833_v39  ;;  %v2951_v49 = vpop.f32.mrb[16].mxu0  ;;  %v1526_v3 = vsel %vm637_vm2, %v1514_v38, %v1516_v19 }
 0x29c   : > { %v2953_v17 = vpop.f32.mrb[17].mxu0  ;;  %v1520_v32 = vpop.permute.xlu0 %1519 }
 0x29d   : > { %4241 = vmatmul.mubr.msk.bf16.gmra.mrb[4].mxu1 %vm385_vm1, %v4994_v53  ;;  %v2955_v18 = vpop.f32.mrb[18].mxu0 }
 0x29e   : > { %4513 = vmatpush1.bf16.msk.msra.mxu1 %vm5915_vm8, %v5827_v34  ;;  %v2957_v6 = vpop.f32.mrb[19].mxu0  ;;  %1354 = vmatprep.mubr.bf16.mxu1 %v5114_v16  ;;  %v1518_v26 = vpop.permute.xlu1 %1517 }
 0x29f   : > { %4516 = vmatprep.subr.msk.bf16.mxu1 %vm5901_vm7, %v5847_v37 }
 0x2a0   : > { %v5961_v42 = vpop.permute.xlu0 %1523 }
 0x2a2   : > { %4519 = vmatpush1.bf16.msk.msra.mxu1 %vm5915_vm8, %v5841_v28  ;;  %v5957_v34 = vpop.permute.xlu1 %1521 }
 0x2a3   : > { %1549 = vmatprep.subr.bf16.mxu1 %v1512_v13  ;;  %v2961_v21 = vpop.f32.mrb[20].mxu0 }
 0x2a4   : > { %v2963_v24 = vpop.f32.mrb[21].mxu0 }
 0x2a5   : > { %4242 = vmatmul.mubr.msk.bf16.gmra.mrb[8].mxu1 %vm385_vm1, %v4995_v20  ;;  %v2965_v25 = vpop.f32.mrb[22].mxu0 }
 0x2a6   : > { %v2967_v29 = vpop.f32.mrb[23].mxu0  ;;  %1364 = vmatprep.mubr.bf16.mxu1 %v5114_v16 }
 0x2ab   : > { %v5955_v36 = vpop.f32.mrb[24].mxu0 }
 0x2ac   : > { %v5959_v41 = vpop.f32.mrb[25].mxu0 }
 0x2ad   : > { %4243 = vmatmul.mubr.msk.bf16.gmra.mrb[12].mxu1 %vm385_vm1, %v4996_v35  ;;  %v5964_v43 = vpop.f32.mrb[26].mxu0 }
 0x2ae   : > { %v5966_v44 = vpop.f32.mrb[27].mxu0  ;;  %1439 = vmatprep.mubr.bf16.mxu1 %v5114_v16 }
 0x2b0   : > { %v3017_v39 = vpop.permute.xlu1 %3016 }
 0x2b1   : > { %v3054_v45 = vadd.f32 %v3017_v39, %v2951_v49  ;;  %v3055_v46 = vadd.f32 %v3017_v39, %v2953_v17  ;;  %v3022_v47 = vpop.permute.xlu0 %3021  ;;  %v1527_v17 = vsel %vm637_vm2, %v1518_v26, %v1520_v32 }
 0x2b2   : > { %v3056_v50 = vadd.f32 %v3022_v47, %v2955_v18  ;;  %v3057_v52 = vadd.f32 %v3022_v47, %v2957_v6 }
 0x2b3   : > { %v3070_v54 = vmax.f32 %v3054_v45, 0.0  ;;  %v3071_v56 = vmax.f32 %v3055_v46, 0.0  ;;  %v5972_v57 = vpop.f32.mrb[28].mxu0 }
 0x2b4   : > { %v3072_v59 = vmax.f32 %v3056_v50, 0.0  ;;  %v3073_v23 = vmax.f32 %v3057_v52, 0.0  ;;  %v5975_v60 = vpop.f32.mrb[29].mxu0  ;;  %v3027_v61 = vpop.permute.xlu1 %3026  ;;  %v4999_v50 = vld [vmem:[%s6602_s3 + $0x10] sm:$0xff]  }
 0x2b5   : > { %v3086_v62 = vsel %vm233_vm5, %v3070_v54, 0.0  ;;  %v3087_v27 = vsel %vm236_vm6, %v3071_v56, 0.0  ;;  %v3058_v28 = vadd.f32 %v3027_v61, %v2961_v21  ;;  %v3059_v1 = vadd.f32 %v3027_v61, %v2963_v24  ;;  %v5981_v30 = vpop.f32.mrb[30].mxu0  ;;  %v3032_v33 = vpop.permute.xlu0 %3031  ;;  %4248 = vmatmul.mubr.msk.bf16.vlgmr.msra.gmra.mrb[0].mxu1 %vm385_vm1, %v4997_v48 }
 0x2b6   : > { %v3088_v37 = vsel %vm233_vm5, %v3072_v59, 0.0  ;;  %v3089_v2 = vsel %vm236_vm6, %v3073_v23, 0.0  ;;  %v5988_v63 = vpack.c.bf16 %v3073_v23, %v3071_v56  ;;  %v5990_v0 = vpack.c.bf16 %v3072_v59, %v3070_v54  ;;  %1550 = vmatpush1.bf16.msra.mxu1 %v1525_v58  ;;  %v5992_v4 = vpop.f32.mrb[31].mxu0  ;;  %1449 = vmatprep.mubr.bf16.mxu1 %v5114_v16 }
 0x2b7   : > { %v5995_v5 = vpack.c.bf16 %v3088_v37, %v3086_v62  ;;  %v5997_v7 = vpack.c.bf16 %v3089_v2, %v3087_v27  ;;  %v3074_v8 = vmax.f32 %v3058_v28, 0.0  ;;  %v3075_v14 = vmax.f32 %v3059_v1, 0.0  ;;  %1551 = vmatprep.subr.bf16.mxu1 %v1516_v19 }
 0x2b8   : > { %v3060_v15 = vadd.f32 %v3032_v33, %v2965_v25  ;;  %v3061_v51 = vadd.f32 %v3032_v33, %v2967_v29  ;;  %v5999_v55 = vpop.permute.xlu1 %1667 }
 0x2b9   : > { %v6002_v9 = vpop.permute.xlu0 %1669  ;;  %3172 = vrot.lane.b32.xlu0 %v5997_v7, %s5113_s10  ;;  %3170 = vrot.lane.b32.xlu1 %v5995_v5, %s5113_s10  ;;  %v3090_v53 = vsel %vm233_vm5, %v3074_v8, 0.0  ;;  %v3091_v12 = vsel %vm236_vm6, %v3075_v14, 0.0 }
 0x2ba   : > { %v3076_v13 = vmax.f32 %v3060_v15, 0.0  ;;  %v3077_v49 = vmax.f32 %v3061_v51, 0.0  ;;  %1552 = vmatpush1.bf16.msra.mxu1 %v1526_v3  ;;  %v1683_v31 = vsel %vm808_vm3, %v5999_v55, %v6002_v9  ;;  %v5002_v55 = vld [vmem:[%s6602_s3 + $0x48] sm:$0xff]  }
 0x2bb   : > { %1553 = vmatprep.subr.bf16.mxu1 %v1520_v32 }
 0x2bc   : > { %v3092_v18 = vsel %vm233_vm5, %v3076_v13, 0.0  ;;  %v3093_v6 = vsel %vm236_vm6, %v3077_v49, 0.0  ;;  %v6020_v38 = vpack.c.bf16 %v3077_v49, %v3075_v14  ;;  %v6022_v19 = vpack.c.bf16 %v3076_v13, %v3074_v8  ;;  %v3037_v20 = vpop.permute.xlu1 %3036 }
 0x2bd   : > { %v6024_v21 = vpack.c.bf16 %v3092_v18, %v3090_v53  ;;  %v6026_v24 = vpack.c.bf16 %v3093_v6, %v3091_v12  ;;  %v3062_v25 = vadd.f32 %v3037_v20, %v5955_v36  ;;  %v3063_v26 = vadd.f32 %v3037_v20, %v5959_v41  ;;  %v3042_v29 = vpop.permute.xlu0 %3041  ;;  %4249 = vmatmul.mubr.msk.bf16.gmra.mrb[4].mxu1 %vm385_vm1, %v4998_v10  ;;  %v5003_v18 = vld [vmem:[%s6602_s3 + $0x50] sm:$0xff]   ;;  %v5004_v20 = vld [vmem:[%s6602_s3 + $0x58] sm:$0xff]  }
 0x2be   : > { %v3064_v32 = vadd.f32 %v3042_v29, %v5964_v43  ;;  %v3065_v35 = vadd.f32 %v3042_v29, %v5966_v44  ;;  %1554 = vmatpush1.bf16.msra.mxu1 %v1527_v17  ;;  %1459 = vmatprep.mubr.bf16.mxu1 %v5114_v16  ;;  %v1528_v43 = vsel %vm637_vm2, %v5957_v34, %v5961_v42 }
 0x2bf   : > { %v3078_v39 = vmax.f32 %v3062_v25, 0.0  ;;  %v3079_v45 = vmax.f32 %v3063_v26, 0.0  ;;  %3176 = vrot.lane.b32.xlu0 %v6026_v24, %s5113_s10  ;;  %3174 = vrot.lane.b32.xlu1 %v6024_v21, %s5113_s10  ;;  %v5005_v26 = vld [vmem:[%s6602_s3 + $0x60] sm:$0xff]  }
 0x2c0   : > { %v3080_v36 = vmax.f32 %v3064_v32, 0.0  ;;  %v3081_v41 = vmax.f32 %v3065_v35, 0.0  ;;  %1555 = vmatprep.subr.bf16.mxu1 %v5961_v42  ;;  %v1672_v46 = vpop.permute.xlu1 %1671 }
 0x2c1   : > { %v3094_v44 = vsel %vm233_vm5, %v3078_v39, 0.0  ;;  %v3095_v47 = vsel %vm236_vm6, %v3079_v45, 0.0  ;;  %v1674_v48 = vpop.permute.xlu0 %1673 }
 0x2c2   : > { %v3096_v52 = vsel %vm233_vm5, %v3080_v36, 0.0  ;;  %v3097_v54 = vsel %vm236_vm6, %v3081_v41, 0.0  ;;  %v6053_v56 = vpack.c.bf16 %v3081_v41, %v3079_v45  ;;  %v6055_v34 = vpack.c.bf16 %v3080_v36, %v3078_v39  ;;  %1556 = vmatpush1.bf16.msra.mxu1 %v1528_v43  ;;  %v1955_v41 = vld [vmem:[%s6603_s4 + $0x8] sm:$0xff] }
 0x2c3   : > { %v6057_v42 = vpack.c.bf16 %v3096_v52, %v3094_v44  ;;  %v6059_v58 = vpack.c.bf16 %v3097_v54, %v3095_v47  ;;  %1707 = vmatprep.subr.bf16.mxu1 %v6002_v9  ;;  %v1684_v12 = vsel %vm808_vm3, %v1672_v46, %v1674_v48  ;;  %v1954_v46 = vld [vmem:[%s6603_s4] sm:$0xff]  ;;  %v5007_v44 = vld [vmem:[%s6602_s3 + $0x70] sm:$0xff]   ;;  %v1957_v47 = vld [vmem:[%s6603_s4 + $0x18] sm:$0xff] }
 0x2c4   : > { %v3047_v59 = vpop.permute.xlu1 %3046  ;;  %v1958_v52 = vld [vmem:[%s6603_s4 + $0x20] sm:$0xff]  ;;  %v5008_v54 = vld [vmem:[%s6602_s3 + $0x78] sm:$0xff]  }
 0x2c5   : > { %v3066_v23 = vadd.f32 %v3047_v59, %v5972_v57  ;;  %v3067_v61 = vadd.f32 %v3047_v59, %v5975_v60  ;;  %v3052_v62 = vpop.permute.xlu0 %3051  ;;  %4250 = vmatmul.mubr.msk.bf16.gmra.mrb[8].mxu1 %vm385_vm1, %v4999_v50  ;;  %3180 = vrot.lane.b32.xlu0 %v6059_v58, %s5113_s10  ;;  %v1959_v50 = vld [vmem:[%s6603_s4 + $0x28] sm:$0xff] }
 0x2c6   : > { %v3068_v27 = vadd.f32 %v3052_v62, %v5981_v30  ;;  %v3069_v28 = vadd.f32 %v3052_v62, %v5992_v4  ;;  %3178 = vrot.lane.b32.xlu1 %v6057_v42, %s5113_s10  ;;  %1469 = vmatprep.mubr.bf16.mxu1 %v5114_v16  ;;  %v5000_v30 = vld [vmem:[%s6602_s3 + $0x18] sm:$0xff]  }
 0x2c7   : > { %v3082_v1 = vmax.f32 %v3066_v23, 0.0  ;;  %v3083_v33 = vmax.f32 %v3067_v61, 0.0  ;;  %v1961_v23 = vld [vmem:[%s6603_s4 + $0x38] sm:$0xff]  ;;  %v5034_v61 = vld [vmem:[%s5203_s9] sm:$0xff] }
 0x2c8   : > { %v3084_v57 = vmax.f32 %v3068_v27, 0.0  ;;  %v3085_v37 = vmax.f32 %v3069_v28, 0.0  ;;  %v1676_v53 = vpop.permute.xlu1 %1675  ;;  %v2018_v62 = vunpack.c.l.bf16 %v5034_v61  ;;  %v2019_v27 = vunpack.c.h.bf16 %v5034_v61  ;;  %v1960_v28 = vld [vmem:[%s6603_s4 + $0x30] sm:$0xff] }
 0x2c9   : > { %v3098_v60 = vsel %vm233_vm5, %v3082_v1, 0.0  ;;  %v3099_v2 = vsel %vm236_vm6, %v3083_v33, 0.0  ;;  %v1678_v10 = vpop.permute.xlu0 %1677 }
 0x2ca   : > { %v3100_v4 = vsel %vm233_vm5, %v3084_v57, 0.0  ;;  %v3101_v8 = vsel %vm236_vm6, %v3085_v37, 0.0  ;;  %v6083_v14 = vpack.c.bf16 %v3085_v37, %v3083_v33  ;;  %v6085_v15 = vpack.c.bf16 %v3084_v57, %v3082_v1  ;;  %v5035_v33 = vld [vmem:[%s5203_s9 + $0x24] sm:$0xff] }
 0x2cb   : > { %v6087_v51 = vpack.c.bf16 %v3100_v4, %v3098_v60  ;;  %v6089_v3 = vpack.c.bf16 %v3101_v8, %v3099_v2  ;;  %v1685_v13 = vsel %vm808_vm3, %v1676_v53, %v1678_v10  ;;  %v2024_v57 = vunpack.c.l.bf16 %v5035_v33  ;;  %v5036_v2 = vld [vmem:[%s5203_s9 + $0x18] sm:$0xff]  ;;  %v5038_v53 = vld [vmem:[%s5203_s9 + $0x30] sm:$0xff] }
 0x2cc   : > { %v1680_v49 = vpop.permute.xlu1 %1679  ;;  %v2025_v37 = vunpack.c.h.bf16 %v5035_v33  ;;  %v4849_v60 = vpack.i.bf16 %v2019_v27, %v2018_v62  ;;  %v2023_v4 = vunpack.c.h.bf16 %v5036_v2  ;;  %v5019_v62 = vld [vmem:[%s6602_s3 + $0x10] sm:$0xff]  }
 0x2cd   : > { %4251 = vmatmul.mubr.msk.bf16.gmra.mrb[12].mxu1 %vm385_vm1, %v5000_v30  ;;  %3184 = vrot.lane.b32.xlu0 %v6089_v3, %s5113_s10  ;;  %v1682_v9 = vpop.permute.xlu0 %1681  ;;  %v2022_v30 = vunpack.c.l.bf16 %v5036_v2 }
 0x2ce   : > { %3182 = vrot.lane.b32.xlu1 %v6087_v51, %s5113_s10  ;;  %1581 = vmatprep.mubr.bf16.mxu1 %v5114_v16  ;;  %v1686_v17 = vsel %vm808_vm3, %v1680_v49, %v1682_v9  ;;  %v4864_v8 = vpack.i.bf16 %v2025_v37, %v2024_v57  ;;  %v5010_v49 = vld [vmem:[%s6602_s3 + $0x88] sm:$0xff]   ;;  %v5021_v57 = vld [vmem:[%s6602_s3 + $0x40] sm:$0xff]   ;;  %s5118_s10 = smov [#allocation3]  }
 0x2cf   : > { %s5053_s23 = sshll.u32 %s5118_s10, 4  ;;  %s5054_s23 = int_to_ptr.vmem [resolvable:$false] %s5053_s23 }
 0x2d0   : > { %v1826_v25 = vpop.permute.xlu1 %1825  ;;  %s5055_s25 = scalar_lea.vmem %s5054_s23, 8192 }
 0x2d1   : > { %3418 = vrot.lane.b32.xlu0 %v5997_v7, %s5115_s11  ;;  %v1828_v6 = vpop.permute.xlu0 %1827 }
 0x2d2   : > { %3416 = vrot.lane.b32.xlu1 %v5995_v5, %s5115_s11  ;;  %v1841_v35 = vsel %vm979_vm4, %v1826_v25, %v1828_v6  ;;  %v5040_v25 = vld [vmem:[%s5203_s9 + $0x48] sm:$0xff] }
 0x2d4   : > { %v1830_v29 = vpop.permute.xlu1 %1829 }
 0x2d5   : > { %4264 = vmatmul.mubr.msk.bf16.vlgmr.msra.gmra.mrb[0].mxu1 %vm385_vm1, %v5001_v22  ;;  %3422 = vrot.lane.b32.xlu0 %v6026_v24, %s5115_s11  ;;  %v1832_v32 = vpop.permute.xlu0 %1831 }
 0x2d6   : > { %1708 = vmatpush1.bf16.msra.mxu1 %v1683_v31  ;;  %3420 = vrot.lane.b32.xlu1 %v6024_v21, %s5115_s11  ;;  %v1842_v45 = vsel %vm979_vm4, %v1830_v29, %v1832_v32  ;;  %v2031_v29 = vunpack.c.h.bf16 %v5040_v25 }
 0x2d7   : > { %1709 = vmatprep.subr.bf16.mxu1 %v1674_v48  ;;  %1591 = vmatprep.mubr.bf16.mxu1 %v5114_v16  ;;  %v1956_v48 = vld [vmem:[%s6603_s4 + $0x10] sm:$0xff] }
 0x2d9   : > { %3426 = vrot.lane.b32.xlu0 %v6059_v58, %s5115_s11  ;;  %v1836_v39 = vpop.permute.xlu0 %1835 }
 0x2da   : > { %1710 = vmatpush1.bf16.msra.mxu1 %v1684_v12  ;;  %3424 = vrot.lane.b32.xlu1 %v6057_v42, %s5115_s11  ;;  %v2026_v12 = vunpack.c.l.bf16 %v5038_v53 }
 0x2db   : > { %1711 = vmatprep.subr.bf16.mxu1 %v1678_v10  ;;  %v4859_v10 = vpack.i.bf16 %v2023_v4, %v2022_v30 }
 0x2dd   : > { %4265 = vmatmul.mubr.msk.bf16.gmra.mrb[4].mxu1 %vm385_vm1, %v5002_v55  ;;  %3430 = vrot.lane.b32.xlu0 %v6089_v3, %s5115_s11  ;;  %v1840_v36 = vpop.permute.xlu0 %1839  ;;  %v2027_v55 = vunpack.c.h.bf16 %v5038_v53 }
 0x2de   : > { %3428 = vrot.lane.b32.xlu1 %v6087_v51, %s5115_s11  ;;  %1712 = vmatpush1.bf16.msra.mxu1 %v1685_v13 }
 0x2df   : > { %1713 = vmatprep.subr.bf16.mxu1 %v1682_v9  ;;  %1601 = vmatprep.mubr.bf16.mxu1 %v5114_v16  ;;  %v4869_v13 = vpack.i.bf16 %v2027_v55, %v2026_v12  ;;  %v5043_v12 = vld [vmem:[%s5203_s9 + $0x78] sm:$0xff] }
 0x2e0   : > { %v3927_v55 = vunpack.c.l.bf16 %v5043_v12 }
 0x2e1   : > { %3575 = vrot.lane.b32.xlu0 %v5997_v7, %s5116_s12 }
 0x2e2   : > { %3573 = vrot.lane.b32.xlu1 %v5995_v5, %s5116_s12  ;;  %1714 = vmatpush1.bf16.msra.mxu1 %v1686_v17  ;;  %v5011_v17 = vld [vmem:[%s6602_s3 + $0x90] sm:$0xff]  }
 0x2e3   : > { %1865 = vmatprep.subr.bf16.mxu1 %v1828_v6 }
 0x2e5   : > { %4266 = vmatmul.mubr.msk.bf16.gmra.mrb[8].mxu1 %vm385_vm1, %v5003_v18  ;;  %3579 = vrot.lane.b32.xlu0 %v6026_v24, %s5116_s12  ;;  %v5039_v18 = vld [vmem:[%s5203_s9 + $0x54] sm:$0xff] }
 0x2e6   : > { %3577 = vrot.lane.b32.xlu1 %v6024_v21, %s5116_s12  ;;  %1611 = vmatprep.mubr.bf16.mxu1 %v5114_v16  ;;  %v2032_v6 = vunpack.c.l.bf16 %v5039_v18 }
 0x2e9   : > { %3583 = vrot.lane.b32.xlu0 %v6059_v58, %s5116_s12 }
 0x2ea   : > { %3581 = vrot.lane.b32.xlu1 %v6057_v42, %s5116_s12 }
 0x2ed   : > { %4267 = vmatmul.mubr.msk.bf16.gmra.mrb[12].mxu1 %vm385_vm1, %v5004_v20  ;;  %3587 = vrot.lane.b32.xlu0 %v6089_v3, %s5116_s12  ;;  %v2033_v20 = vunpack.c.h.bf16 %v5039_v18  ;;  %v5044_v18 = vld [vmem:[%s5203_s9 + $0x84] sm:$0xff] }
 0x2ee   : > { %3585 = vrot.lane.b32.xlu1 %v6087_v51, %s5116_s12  ;;  %1739 = vmatprep.mubr.bf16.mxu1 %v5114_v16 }
 0x2f1   : > { %3732 = vrot.lane.b32.xlu0 %v5997_v7, %s5117_s13  ;;  %v1834_v7 = vpop.permute.xlu1 %1833 }
 0x2f2   : > { %3730 = vrot.lane.b32.xlu1 %v5995_v5, %s5117_s13  ;;  %v5006_v5 = vld [vmem:[%s6602_s3 + $0x68] sm:$0xff]  }
 0x2f5   : > { %3736 = vrot.lane.b32.xlu0 %v6026_v24, %s5117_s13  ;;  %4280 = vmatmul.mubr.msk.bf16.vlgmr.msra.gmra.mrb[0].mxu1 %vm385_vm1, %v5005_v26  ;;  %v1838_v24 = vpop.permute.xlu1 %1837  ;;  %v2030_v26 = vunpack.c.l.bf16 %v5040_v25 }
 0x2f6   : > { %3734 = vrot.lane.b32.xlu1 %v6024_v21, %s5117_s13  ;;  %1866 = vmatpush1.bf16.msra.mxu1 %v1841_v35  ;;  %v1843_v21 = vsel %vm979_vm4, %v1834_v7, %v1836_v39  ;;  %v1844_v43 = vsel %vm979_vm4, %v1838_v24, %v1840_v36  ;;  %v4884_v35 = vpack.i.bf16 %v2033_v20, %v2032_v6  ;;  %v3929_v6 = vunpack.c.l.bf16 %v5044_v18 }
 0x2f7   : > { %1867 = vmatprep.subr.bf16.mxu1 %v1832_v32  ;;  %1749 = vmatprep.mubr.bf16.mxu1 %v5114_v16  ;;  %v5012_v32 = vld [vmem:[%s6602_s3 + $0x98] sm:$0xff]   ;;  %v3930_v20 = vunpack.c.h.bf16 %v5044_v18 }
 0x2f9   : > { %3740 = vrot.lane.b32.xlu0 %v6059_v58, %s5117_s13 }
 0x2fa   : > { %3738 = vrot.lane.b32.xlu1 %v6057_v42, %s5117_s13  ;;  %1868 = vmatpush1.bf16.msra.mxu1 %v1842_v45  ;;  %v5033_v42 = vld [vmem:[%s5203_s9 + $0xc] sm:$0xff]  ;;  %v4879_v45 = vpack.i.bf16 %v2031_v29, %v2030_v26 }
 0x2fb   : > { %1869 = vmatprep.subr.bf16.mxu1 %v1836_v39  ;;  %v2020_v58 = vunpack.c.l.bf16 %v5033_v42  ;;  %v2021_v59 = vunpack.c.h.bf16 %v5033_v42  ;;  %v5018_v42 = vld [vmem:[%s6602_s3 + $0x8] sm:$0xff]  }
 0x2fd   : > { %3744 = vrot.lane.b32.xlu0 %v6089_v3, %s5117_s13  ;;  %4281 = vmatmul.mubr.msk.bf16.gmra.mrb[4].mxu1 %vm385_vm1, %v5006_v5  ;;  %v4854_v1 = vpack.i.bf16 %v2021_v59, %v2020_v58  ;;  %v5037_v3 = vld [vmem:[%s5203_s9 + $0x3c] sm:$0xff] }
 0x2fe   : > { %3742 = vrot.lane.b32.xlu1 %v6087_v51, %s5117_s13  ;;  %1870 = vmatpush1.bf16.msra.mxu1 %v1843_v21  ;;  %v5009_v51 = vld [vmem:[%s6602_s3 + $0x80] sm:$0xff]   ;;  %v2028_v22 = vunpack.c.l.bf16 %v5037_v3  ;;  %v2029_v31 = vunpack.c.h.bf16 %v5037_v3 }
 0x2ff   : > { %1871 = vmatprep.subr.bf16.mxu1 %v1840_v36  ;;  %1759 = vmatprep.mubr.bf16.mxu1 %v5114_v16 }
 0x300   : > { %v4874_v9 = vpack.i.bf16 %v2029_v31, %v2028_v22  ;;  %v5042_v31 = vld [vmem:[%s5203_s9 + $0x6c] sm:$0xff] }
 0x301   : > { %1969 = vperm.xlu0 %4847, %v1955_v41   ;;  %v3926_v53 = vunpack.c.h.bf16 %v5042_v31 }
 0x302   : > { %1964 = vperm.xlu1 %4848, %v1954_v46   ;;  %1872 = vmatpush1.bf16.msra.mxu1 %v1844_v43 }
 0x305   : > { %1979 = vperm.xlu0 %4847, %v1957_v47   ;;  %4282 = vmatmul.mubr.msk.bf16.gmra.mrb[8].mxu1 %vm385_vm1, %v5007_v44 }
 0x306   : > { %1974 = vperm.xlu1 %4848, %v1956_v48   ;;  %1769 = vmatprep.mubr.bf16.mxu1 %v5114_v16 }
 0x309   : > { %1989 = vperm.xlu0 %4847, %v1959_v50  }
 0x30a   : > { %1984 = vperm.xlu1 %4848, %v1958_v52  }
 0x30d   : > { %1999 = vperm.xlu0 %4847, %v1961_v23   ;;  %4283 = vmatmul.mubr.msk.bf16.gmra.mrb[12].mxu1 %vm385_vm1, %v5008_v54 }
 0x30e   : > { %1994 = vperm.xlu1 %4848, %v1960_v28   ;;  %1897 = vmatprep.mubr.bf16.mxu1 %v5114_v16 }
 0x311   : > { %4855 = vrot.lane.b32.xlu0 %v4854_v1, %s5115_s11 }
 0x312   : > { %4850 = vrot.lane.b32.xlu1 %v4849_v60, %s5115_s11 }
 0x315   : > { %4865 = vrot.lane.b32.xlu0 %v4864_v8, %s5115_s11  ;;  %4296 = vmatmul.mubr.msk.bf16.vlgmr.msra.gmra.mrb[0].mxu1 %vm385_vm1, %v5009_v51  ;;  %v5022_v8 = vld [vmem:[%s6602_s3 + $0x48] sm:$0xff]   ;;  %v5041_v51 = vld [vmem:[%s5203_s9 + $0x60] sm:$0xff] }
 0x316   : > { %4860 = vrot.lane.b32.xlu1 %v4859_v10, %s5115_s11  ;;  %1907 = vmatprep.mubr.bf16.mxu1 %v5114_v16  ;;  %v3923_v3 = vunpack.c.l.bf16 %v5041_v51  ;;  %v3924_v22 = vunpack.c.h.bf16 %v5041_v51  ;;  %v3925_v10 = vunpack.c.l.bf16 %v5042_v31 }
 0x319   : > { %4875 = vrot.lane.b32.xlu0 %v4874_v9, %s5115_s11  ;;  %v3928_v9 = vunpack.c.h.bf16 %v5043_v12  ;;  %v5032_v12 = vld [vmem:[%s6602_s3 + $0x98] sm:$0xff]  }
 0x31a   : > { %4870 = vrot.lane.b32.xlu1 %v4869_v13, %s5115_s11 }
 0x31b   : > { %v4899_v29 = vpack.i.bf16 %v3928_v9, %v3927_v55 }
 0x31d   : > { %3874 = vperm.xlu0 %4847, %v1955_v41   ;;  %4297 = vmatmul.mubr.msk.bf16.gmra.mrb[4].mxu1 %vm385_vm1, %v5010_v49  ;;  %v4889_v49 = vpack.i.bf16 %v3924_v22, %v3923_v3  ;;  %v5031_v22 = vld [vmem:[%s6602_s3 + $0x90] sm:$0xff]  }
 0x31e   : > { %3869 = vperm.xlu1 %4848, %v1954_v46   ;;  %1917 = vmatprep.mubr.bf16.mxu1 %v5114_v16 }
 0x321   : > { %3884 = vperm.xlu0 %4847, %v1957_v47  }
 0x322   : > { %3879 = vperm.xlu1 %4848, %v1956_v48  }
 0x325   : > { %3894 = vperm.xlu0 %4847, %v1959_v50   ;;  %4298 = vmatmul.mubr.msk.bf16.gmra.mrb[8].mxu1 %vm385_vm1, %v5011_v17  ;;  %v5013_v50 = vld [vmem:[%s6602_s3 + $0x20] sm:$0xff]   ;;  %v4894_v17 = vpack.i.bf16 %v3926_v53, %v3925_v10 }
 0x326   : > { %3889 = vperm.xlu1 %4848, %v1958_v52   ;;  %1927 = vmatprep.mubr.bf16.mxu1 %v5114_v16  ;;  %v5014_v52 = vld [vmem:[%s6602_s3 + $0x28] sm:$0xff]  }
 0x329   : > { %3904 = vperm.xlu0 %4847, %v1961_v23  }
 0x32a   : > { %3899 = vperm.xlu1 %4848, %v1960_v28   ;;  %v5020_v28 = vld [vmem:[%s6602_s3 + $0x18] sm:$0xff]  }
 0x32b   : > { %v3173_v7 = vpop.permute.xlu0 %3172  ;;  %v3171_v39 = vpop.permute.xlu1 %3170 }
 0x32c   : > { %v3186_v5 = vsel %vm368_vm0, %v3171_v39, %v3173_v7  ;;  %3210 = vmatprep.subr.bf16.mxu1 %v3173_v7  ;;  %v4904_v39 = vpack.i.bf16 %v3930_v20, %v3929_v6 }
 0x32d   : > { %4299 = vmatmul.mubr.msk.bf16.gmra.mrb[12].mxu1 %vm385_vm1, %v5012_v32  ;;  %4885 = vrot.lane.b32.xlu0 %v4884_v35, %s5115_s11  ;;  %v5045_v32 = vld [vmem:[%s5203_s9 + $0x90] sm:$0xff] }
 0x32e   : > { %3211 = vmatpush1.bf16.msra.mxu1 %v3186_v5  ;;  %3242 = vmatprep.mubr.bf16.mxu1 %v5114_v16  ;;  %v3931_v35 = vunpack.c.l.bf16 %v5045_v32  ;;  %v3932_v7 = vunpack.c.h.bf16 %v5045_v32 }
 0x32f   : > { %4880 = vrot.lane.b32.xlu1 %v4879_v45, %s5115_s11  ;;  %v5046_v45 = vld [vmem:[%s5203_s9 + $0x9c] sm:$0xff] }
 0x330   : > { %v3933_v5 = vunpack.c.l.bf16 %v5046_v45 }
 0x331   : > { %v3177_v21 = vpop.permute.xlu0 %3176  ;;  %v3175_v24 = vpop.permute.xlu1 %3174  ;;  %4895 = vrot.lane.b32.xlu0 %v4894_v17, %s5115_s11 }
 0x332   : > { %v3187_v36 = vsel %vm368_vm0, %v3175_v24, %v3177_v21  ;;  %3212 = vmatprep.subr.bf16.mxu1 %v3177_v21  ;;  %v3934_v21 = vunpack.c.h.bf16 %v5046_v45 }
 0x333   : > { %3213 = vmatpush1.bf16.msra.mxu1 %v3187_v36  ;;  %4890 = vrot.lane.b32.xlu1 %v4889_v49, %s5115_s11  ;;  %v5023_v36 = vld [vmem:[%s6602_s3 + $0x50] sm:$0xff]  }
 0x335   : > { %4905 = vrot.lane.b32.xlu0 %v4904_v39, %s5115_s11 }
 0x337   : > { %v3181_v41 = vpop.permute.xlu0 %3180  ;;  %4900 = vrot.lane.b32.xlu1 %v4899_v29, %s5115_s11 }
 0x338   : > { %v3179_v46 = vpop.permute.xlu1 %3178  ;;  %3214 = vmatprep.subr.bf16.mxu1 %v3181_v41 }
 0x339   : > { %v3188_v43 = vsel %vm368_vm0, %v3179_v46, %v3181_v41  ;;  %v4909_v46 = vpack.i.bf16 %v3932_v7, %v3931_v35 }
 0x33a   : > { %3215 = vmatpush1.bf16.msra.mxu1 %v3188_v43  ;;  %v5047_v43 = vld [vmem:[%s5203_s9 + $0xa8] sm:$0xff] }
 0x33b   : > { %4910 = vrot.lane.b32.xlu1 %v4909_v46, %s5115_s11 }
 0x33f   : > { %v3185_v44 = vpop.permute.xlu0 %3184 }
 0x340   : > { %v3183_v47 = vpop.permute.xlu1 %3182  ;;  %3216 = vmatprep.subr.bf16.mxu1 %v3185_v44 }
 0x341   : > { %v3189_v48 = vsel %vm368_vm0, %v3183_v47, %v3185_v44  ;;  %v3935_v44 = vunpack.c.l.bf16 %v5047_v43  ;;  %v3936_v47 = vunpack.c.h.bf16 %v5047_v43 }
 0x342   : > { %3217 = vmatpush1.bf16.msra.mxu1 %v3189_v48  ;;  %v4914_v48 = vpack.i.bf16 %v3934_v21, %v3933_v5 }
 0x343   : > { %4522 = vmatprep.subr.msk.bf16.mxu1 %vm5901_vm7, %v5988_v63  ;;  %v5015_v63 = vld [vmem:[%s6602_s3 + $0x30] sm:$0xff]  }
 0x344   : > { %v3417_v40 = vpop.permute.xlu1 %3416  ;;  %4915 = vrot.lane.b32.xlu0 %v4914_v48, %s5115_s11 }
 0x345   : > { %4412 = vmatmul.mubr.msk.bf16.vlgmr.msra.gmra.mrb[16].mxu1 %vm385_vm1, %v5013_v50  ;;  %v5048_v50 = vld [vmem:[%s5203_s9 + $0xb4] sm:$0xff]  ;;  %s218_s9 = sand.u32 1, %s5103_s19  }
 0x346   : > { %4525 = vmatpush1.bf16.msk.msra.mxu1 %vm5915_vm8, %v5990_v0  ;;  %3252 = vmatprep.mubr.bf16.mxu1 %v5114_v16  ;;  %v3419_v0 = vpop.permute.xlu0 %3418  ;;  %s4141_s7 = sshll.u32 %s218_s9, 8  ;;  %s6558_s22 = scalar_lea.sflag [#allocation4], %s218_s9 }
 0x347   : > { %4528 = vmatprep.subr.msk.bf16.mxu1 %vm5901_vm7, %v6020_v38  ;;  %v5016_v38 = vld [vmem:[%s6602_s3 + $0x38] sm:$0xff]  }
 0x34a   : > { %4531 = vmatpush1.bf16.msk.msra.mxu1 %vm5915_vm8, %v6022_v19  ;;  %v3423_v19 = vpop.permute.xlu0 %3422 }
 0x34b   : > { %4534 = vmatprep.subr.msk.bf16.mxu1 %vm5901_vm7, %v6053_v56  ;;  %v3421_v56 = vpop.permute.xlu1 %3420 }
 0x34c   : > { %v3433_v54 = vsel %vm637_vm2, %v3421_v56, %v3423_v19 }
 0x34d   : > { %4413 = vmatmul.mubr.msk.bf16.gmra.mrb[20].mxu1 %vm385_vm1, %v5014_v52  ;;  %v3937_v52 = vunpack.c.l.bf16 %v5048_v50 }
 0x34e   : > { %4537 = vmatpush1.bf16.msk.msra.mxu1 %vm5915_vm8, %v6055_v34  ;;  %3262 = vmatprep.mubr.bf16.mxu1 %v5114_v16  ;;  %v3432_v34 = vsel %vm637_vm2, %v3417_v40, %v3419_v0  ;;  %v5024_v40 = vld [vmem:[%s6602_s3 + $0x58] sm:$0xff]  }
 0x34f   : > { %4540 = vmatprep.subr.msk.bf16.mxu1 %vm5901_vm7, %v6083_v14  ;;  %v3427_v14 = vpop.permute.xlu0 %3426 }
 0x352   : > { %4543 = vmatpush1.bf16.msk.msra.mxu1 %vm5915_vm8, %v6085_v15  ;;  %v3425_v15 = vpop.permute.xlu1 %3424 }
 0x353   : > { %3456 = vmatprep.subr.bf16.mxu1 %v3419_v0  ;;  %v3431_v58 = vpop.permute.xlu0 %3430  ;;  %v3434_v59 = vsel %vm637_vm2, %v3425_v15, %v3427_v14  ;;  %v4919_v0 = vpack.i.bf16 %v3936_v47, %v3935_v44 }
 0x355   : > { %4414 = vmatmul.mubr.msk.bf16.gmra.mrb[24].mxu1 %vm385_vm1, %v5015_v63  ;;  %v3938_v63 = vunpack.c.h.bf16 %v5048_v50  ;;  %4920 = vrot.lane.b32.xlu1 %v4919_v0, %s5115_s11 }
 0x356   : > { %3272 = vmatprep.mubr.bf16.mxu1 %v5114_v16  ;;  %v3429_v23 = vpop.permute.xlu1 %3428 }
 0x357   : > { %v3435_v61 = vsel %vm637_vm2, %v3429_v23, %v3431_v58  ;;  %v3576_v27 = vpop.permute.xlu0 %3575 }
 0x35a   : > { %v3574_v1 = vpop.permute.xlu1 %3573 }
 0x35b   : > { %v3580_v33 = vpop.permute.xlu0 %3579  ;;  %v3589_v60 = vsel %vm808_vm3, %v3574_v1, %v3576_v27  ;;  %v5028_v1 = vld [vmem:[%s6602_s3 + $0x78] sm:$0xff]  }
 0x35d   : > { %4415 = vmatmul.mubr.msk.bf16.gmra.mrb[28].mxu1 %vm385_vm1, %v5016_v38  ;;  %v4924_v38 = vpack.i.bf16 %v3938_v63, %v3937_v52 }
 0x35e   : > { %3347 = vmatprep.mubr.bf16.mxu1 %v5114_v16  ;;  %v3578_v37 = vpop.permute.xlu1 %3577 }
 0x35f   : > { %v3584_v2 = vpop.permute.xlu0 %3583  ;;  %v3590_v4 = vsel %vm808_vm3, %v3578_v37, %v3580_v33  ;;  %4925 = vrot.lane.b32.xlu0 %v4924_v38, %s5115_s11  ;;  %s6445_s11 = scalar_lea.vmem [#allocation3], %s4141_s7 }
 0x360   : > { %s4075_s12 = sshll.u32 %s6445_s11, 4  ;;  %s6549_s12 = int_to_ptr.vmem [resolvable:$true] %s4075_s12 }
 0x361   : > { %s5049_s17 = scalar_lea.vmem %s6549_s12, 4096  ;;  %p5056_p0 = scmp.lt.s32.totalorder %s6549_s12, %s5054_s23 }
 0x362   : > { %v3582_v30 = vpop.permute.xlu1 %3581  ;;  %p5050_p11 = scmp.ne.s32.totalorder %s6549_s12, %s5049_s17  ;;  %p5057_p1 = scmp.lt.s32.totalorder %s5055_s25, %s5049_s17 }
 0x363   : > { %v3588_v13 = vpop.permute.xlu0 %3587  ;;  %v3591_v25 = vsel %vm808_vm3, %v3582_v30, %v3584_v2 }
 0x364   : > { %p5051_p12 = pnand %p5050_p11, %p5189_p5  ;;  %p5058_p2 = por %p5057_p1, %p5056_p0 }
 0x365   : > { %4420 = vmatmul.mubr.msk.bf16.vlgmr.msra.gmra.mrb[16].mxu1 %vm385_vm1, %v5017_v11  ;;  %v5025_v11 = vld [vmem:[%s6602_s3 + $0x60] sm:$0xff]  }
 0x366   : > { %3457 = vmatpush1.bf16.msra.mxu1 %v3432_v34  ;;  %3357 = vmatprep.mubr.bf16.mxu1 %v5114_v16  ;;  %v3586_v26 = vpop.permute.xlu1 %3585  ;;  %p5052_p13 = pneg %p5051_p12 }
 0x367   : > { %3458 = vmatprep.subr.bf16.mxu1 %v3423_v19  ;;  %v3592_v24 = vsel %vm808_vm3, %v3586_v26, %v3588_v13  ;;  %v3733_v41 = vpop.permute.xlu0 %3732 }
 0x368   : > { %p5059_p3 = pnand %p5058_p2, %p5052_p13 }
 0x36a   : > { %3459 = vmatpush1.bf16.msra.mxu1 %v3433_v54  ;;  %v3731_v19 = vpop.permute.xlu1 %3730 }
 0x36b   : > { %3460 = vmatprep.subr.bf16.mxu1 %v3427_v14  ;;  %v3737_v56 = vpop.permute.xlu0 %3736  ;;  %v3746_v14 = vsel %vm979_vm4, %v3731_v19, %v3733_v41 }
 0x36d   : > { %4421 = vmatmul.mubr.msk.bf16.gmra.mrb[20].mxu1 %vm385_vm1, %v5018_v42 }
 0x36e   : > { %3461 = vmatpush1.bf16.msra.mxu1 %v3434_v59  ;;  %3367 = vmatprep.mubr.bf16.mxu1 %v5114_v16  ;;  %v3735_v34 = vpop.permute.xlu1 %3734 }
 0x36f   : > { %3462 = vmatprep.subr.bf16.mxu1 %v3431_v58  ;;  %v3741_v15 = vpop.permute.xlu0 %3740  ;;  %v3747_v42 = vsel %vm979_vm4, %v3735_v34, %v3737_v56  ;;  %v5026_v58 = vld [vmem:[%s6602_s3 + $0x68] sm:$0xff]  }
 0x372   : > { %3463 = vmatpush1.bf16.msra.mxu1 %v3435_v61  ;;  %v3739_v54 = vpop.permute.xlu1 %3738 }
 0x373   : > { %3613 = vmatprep.subr.bf16.mxu1 %v3576_v27  ;;  %v3748_v59 = vsel %vm979_vm4, %v3739_v54, %v3741_v15  ;;  %v3745_v23 = vpop.permute.xlu0 %3744  ;;  %v5027_v27 = vld [vmem:[%s6602_s3 + $0x70] sm:$0xff]  }
 0x375   : > { %4422 = vmatmul.mubr.msk.bf16.gmra.mrb[24].mxu1 %vm385_vm1, %v5019_v62 }
 0x376   : > { %3377 = vmatprep.mubr.bf16.mxu1 %v5114_v16  ;;  %v3743_v61 = vpop.permute.xlu1 %3742 }
 0x377   : > { %v3749_v62 = vsel %vm979_vm4, %v3743_v61, %v3745_v23 }
 0x37d   : > { %4423 = vmatmul.mubr.msk.bf16.gmra.mrb[28].mxu1 %vm385_vm1, %v5020_v28 }
 0x37e   : > { %3488 = vmatprep.mubr.bf16.mxu1 %v5114_v16 }
 0x381   : > { %v1965_v28 = vpop.permute.xlu1 %1964 }
 0x385   : > { %4436 = vmatmul.mubr.msk.bf16.vlgmr.msra.gmra.mrb[16].mxu1 %vm385_vm1, %v5021_v57  ;;  %v6391_v57 = vpop.permute.xlu1 %1974 }
 0x386   : > { %3614 = vmatpush1.bf16.msra.mxu1 %v3589_v60  ;;  %3498 = vmatprep.mubr.bf16.mxu1 %v5114_v16  ;;  %v5029_v60 = vld [vmem:[%s6602_s3 + $0x80] sm:$0xff]  }
 0x387   : > { %3615 = vmatprep.subr.bf16.mxu1 %v3580_v33  ;;  %v1970_v33 = vpop.permute.xlu0 %1969 }
 0x38a   : > { %3616 = vmatpush1.bf16.msra.mxu1 %v3590_v4  ;;  %v5030_v4 = vld [vmem:[%s6602_s3 + $0x88] sm:$0xff]  }
 0x38b   : > { %3617 = vmatprep.subr.bf16.mxu1 %v3584_v2  ;;  %v6393_v37 = vpop.permute.xlu0 %1979  ;;  %v6398_v2 = vpop.permute.xlu1 %1984 }
 0x38d   : > { %4437 = vmatmul.mubr.msk.bf16.gmra.mrb[20].mxu1 %vm385_vm1, %v5022_v8 }
 0x38e   : > { %3618 = vmatpush1.bf16.msra.mxu1 %v3591_v25  ;;  %3508 = vmatprep.mubr.bf16.mxu1 %v5114_v16 }
 0x38f   : > { %3619 = vmatprep.subr.bf16.mxu1 %v3588_v13  ;;  %v6402_v30 = vpop.permute.xlu0 %1989  ;;  %v6407_v8 = vpop.permute.xlu1 %1994 }
 0x392   : > { %3620 = vmatpush1.bf16.msra.mxu1 %v3592_v24 }
 0x393   : > { %3770 = vmatprep.subr.bf16.mxu1 %v3733_v41  ;;  %v6409_v51 = vpop.permute.xlu0 %1999  ;;  %v4851_v3 = vpop.permute.xlu1 %4850 }
 0x394   : > { %v4853_v49 = vunpack.i.h.bf16 %v4851_v3  ;;  %v4852_v17 = vunpack.i.l.bf16 %v4851_v3 }
 0x395   : > { %4438 = vmatmul.mubr.msk.bf16.gmra.mrb[24].mxu1 %vm385_vm1, %v5023_v36 }
 0x396   : > { %3518 = vmatprep.mubr.bf16.mxu1 %v5114_v16  ;;  %v2083_v25 = vsel %vm637_vm2, %v4852_v17, %v4853_v49 }
 0x397   : > { %v4856_v31 = vpop.permute.xlu0 %4855  ;;  %v4861_v10 = vpop.permute.xlu1 %4860 }
 0x398   : > { %v4857_v6 = vunpack.i.l.bf16 %v4856_v31  ;;  %v4863_v36 = vunpack.i.h.bf16 %v4861_v10  ;;  %v4862_v41 = vunpack.i.l.bf16 %v4861_v10 }
 0x39b   : > { %v6418_v53 = vpop.permute.xlu0 %4865  ;;  %v6423_v55 = vpop.permute.xlu1 %4870 }
 0x39c   : > { %v4868_v48 = vunpack.i.h.bf16 %v6418_v53  ;;  %v4867_v50 = vunpack.i.l.bf16 %v6418_v53  ;;  %v4873_v61 = vunpack.i.h.bf16 %v6423_v55 }
 0x39d   : > { %4439 = vmatmul.mubr.msk.bf16.gmra.mrb[28].mxu1 %vm385_vm1, %v5024_v40 }
 0x39e   : > { %3645 = vmatprep.mubr.bf16.mxu1 %v5114_v16 }
 0x39f   : > { %v6426_v9 = vpop.permute.xlu0 %4875  ;;  %v6428_v13 = vpop.permute.xlu1 %3869 }
 0x3a3   : > { %v6430_v18 = vpop.permute.xlu0 %3874  ;;  %v6434_v26 = vpop.permute.xlu1 %3879 }
 0x3a5   : > { %4452 = vmatmul.mubr.msk.bf16.vlgmr.msra.gmra.mrb[16].mxu1 %vm385_vm1, %v5025_v11  ;;  %v2085_v11 = vsel %vm637_vm2, %v4862_v41, %v4863_v36 }
 0x3a6   : > { %3771 = vmatpush1.bf16.msra.mxu1 %v3746_v14  ;;  %3655 = vmatprep.mubr.bf16.mxu1 %v5114_v16 }
 0x3a7   : > { %3772 = vmatprep.subr.bf16.mxu1 %v3737_v56  ;;  %v6439_v45 = vpop.permute.xlu0 %3884  ;;  %v6443_v0 = vpop.permute.xlu1 %3889 }
 0x3aa   : > { %3773 = vmatpush1.bf16.msra.mxu1 %v3747_v42  ;;  %v2086_v42 = vsel %vm637_vm2, %v4867_v50, %v4868_v48 }
 0x3ab   : > { %3774 = vmatprep.subr.bf16.mxu1 %v3741_v15  ;;  %v6451_v56 = vpop.permute.xlu0 %3894 }
 0x3ad   : > { %4453 = vmatmul.mubr.msk.bf16.gmra.mrb[20].mxu1 %vm385_vm1, %v5026_v58 }
 0x3ae   : > { %3775 = vmatpush1.bf16.msra.mxu1 %v3748_v59  ;;  %3665 = vmatprep.mubr.bf16.mxu1 %v5114_v16 }
 0x3af   : > { %3776 = vmatprep.subr.bf16.mxu1 %v3745_v23 }
 0x3b2   : > { %3777 = vmatpush1.bf16.msra.mxu1 %v3749_v62  ;;  %v4872_v62 = vunpack.i.l.bf16 %v6423_v55 }
 0x3b5   : > { %4454 = vmatmul.mubr.msk.bf16.gmra.mrb[24].mxu1 %vm385_vm1, %v5027_v27 }
 0x3b6   : > { %3675 = vmatprep.mubr.bf16.mxu1 %v5114_v16 }
 0x3bd   : > { %4455 = vmatmul.mubr.msk.bf16.gmra.mrb[28].mxu1 %vm385_vm1, %v5028_v1  ;;  %v6463_v1 = vpop.permute.xlu1 %3899 }
 0x3be   : > { %3802 = vmatprep.mubr.bf16.mxu1 %v5114_v16 }
 0x3c1   : > { %v4881_v17 = vpop.permute.xlu1 %4880 }
 0x3c5   : > { %4468 = vmatmul.mubr.msk.bf16.vlgmr.msra.gmra.mrb[16].mxu1 %vm385_vm1, %v5029_v60  ;;  %v4878_v60 = vunpack.i.h.bf16 %v6426_v9 }
 0x3c6   : > { %3812 = vmatprep.mubr.bf16.mxu1 %v5114_v16 }
 0x3cd   : > { %4469 = vmatmul.mubr.msk.bf16.gmra.mrb[20].mxu1 %vm385_vm1, %v5030_v4  ;;  %v4877_v4 = vunpack.i.l.bf16 %v6426_v9 }
 0x3ce   : > { %3822 = vmatprep.mubr.bf16.mxu1 %v5114_v16 }
 0x3d5   : > { %4470 = vmatmul.mubr.msk.bf16.gmra.mrb[24].mxu1 %vm385_vm1, %v5031_v22 }
 0x3d6   : > { %3832 = vmatprep.mubr.bf16.mxu1 %v5114_v16  ;;  %v4858_v16 = vunpack.i.h.bf16 %v4856_v31  ;;  %v6467_v31 = vpop.permute.xlu0 %3904 }
 0x3d8   : > { %v2084_v39 = vsel %vm637_vm2, %v4857_v6, %v4858_v16  ;;  %v2088_v6 = vsel %vm637_vm2, %v4877_v4, %v4878_v60 }
 0x3dd   : > { %4471 = vmatmul.mubr.msk.bf16.gmra.mrb[28].mxu1 %vm385_vm1, %v5032_v12 }
 0x3e8   : > { %v1899_v20 = vpop.f32.mrb[0].mxu1 }
 0x3e9   : > { %v2002_v29 = vadd.f32 %v1965_v28, %v1899_v20  ;;  %v1901_v32 = vpop.f32.mrb[1].mxu1 }
 0x3ea   : > { %v2003_v35 = vadd.f32 %v1965_v28, %v1901_v32  ;;  %v1903_v7 = vpop.f32.mrb[2].mxu1  ;;  %v4886_v32 = vpop.permute.xlu0 %4885 }
 0x3eb   : > { %v2107_v5 = vadd.f32 %v2083_v25, %v2002_v29  ;;  %v2004_v21 = vadd.f32 %v1970_v33, %v1903_v7  ;;  %v1905_v24 = vpop.f32.mrb[3].mxu1  ;;  %v4888_v41 = vunpack.i.h.bf16 %v4886_v32 }
 0x3ec   : > { %v2108_v46 = vadd.f32 %v4853_v49, %v2003_v35  ;;  %v2005_v43 = vadd.f32 %v1970_v33, %v1905_v24 }
 0x3ed   : > { %v2123_v44 = vmax.f32 %v2107_v5, 0.0  ;;  %v2109_v47 = vadd.f32 %v2084_v39, %v2004_v21  ;;  %v4883_v39 = vunpack.i.h.bf16 %v4881_v17  ;;  %v4882_v5 = vunpack.i.l.bf16 %v4881_v17 }
 0x3ee   : > { %v2124_v52 = vmax.f32 %v2108_v46, 0.0  ;;  %v2110_v63 = vadd.f32 %v4858_v16, %v2005_v43  ;;  %v4887_v46 = vunpack.i.l.bf16 %v4886_v32 }
 0x3ef   : > { %2139 = vst [vmem:[%s6445_s11] sm:$0xff] %v2123_v44  ;;  %v2125_v38 = vmax.f32 %v2109_v47, 0.0 }
 0x3f0   : > { %2141 = vst.msk [vmem:[%s6445_s11 + $0x8] sm:$0xff] %vm979_vm4, %v2124_v52  ;;  %v2126_v40 = vmax.f32 %v2110_v63, 0.0  ;;  %v1909_v19 = vpop.f32.mrb[4].mxu1 }
 0x3f1   : > { %2142 = vst [vmem:[%s6445_s11 + $0x10] sm:$0xff] %v2125_v38  ;;  %v2006_v34 = vadd.f32 %v6391_v57, %v1909_v19  ;;  %v1911_v14 = vpop.f32.mrb[5].mxu1  ;;  %v2090_v38 = vsel %vm637_vm2, %v4887_v46, %v4888_v41 }
 0x3f2   : > { %2143 = vst.msk [vmem:[%s6445_s11 + $0x18] sm:$0xff] %vm979_vm4, %v2126_v40  ;;  %v2007_v15 = vadd.f32 %v6391_v57, %v1911_v14  ;;  %v1913_v54 = vpop.f32.mrb[6].mxu1 }
 0x3f3   : > { %v2111_v58 = vadd.f32 %v2085_v11, %v2006_v34  ;;  %v2008_v59 = vadd.f32 %v6393_v37, %v1913_v54  ;;  %v1915_v23 = vpop.f32.mrb[7].mxu1 }
 0x3f4   : > { %v2112_v27 = vadd.f32 %v4863_v36, %v2007_v15  ;;  %v2009_v28 = vadd.f32 %v6393_v37, %v1915_v23  ;;  %v2087_v37 = vsel %vm637_vm2, %v4872_v62, %v4873_v61  ;;  %v4891_v23 = vpop.permute.xlu1 %4890 }
 0x3f5   : > { %v2127_v33 = vmax.f32 %v2111_v58, 0.0  ;;  %v2113_v57 = vadd.f32 %v2086_v42, %v2008_v59  ;;  %v4893_v62 = vunpack.i.h.bf16 %v4891_v23 }
 0x3f6   : > { %v2128_v3 = vmax.f32 %v2112_v27, 0.0  ;;  %v2114_v22 = vadd.f32 %v4868_v48, %v2009_v28  ;;  %v2089_v48 = vsel %vm637_vm2, %v4882_v5, %v4883_v39  ;;  %v4892_v27 = vunpack.i.l.bf16 %v4891_v23 }
 0x3f7   : > { %2144 = vst [vmem:[%s6445_s11 + $0x20] sm:$0xff] %v2127_v33  ;;  %v2129_v10 = vmax.f32 %v2113_v57, 0.0 }
 0x3f8   : > { %2145 = vst.msk [vmem:[%s6445_s11 + $0x28] sm:$0xff] %vm979_vm4, %v2128_v3  ;;  %v2130_v53 = vmax.f32 %v2114_v22, 0.0  ;;  %v1919_v12 = vpop.f32.mrb[8].mxu1  ;;  %v4901_v3 = vpop.permute.xlu1 %4900 }
 0x3f9   : > { %2146 = vst [vmem:[%s6445_s11 + $0x30] sm:$0xff] %v2129_v10  ;;  %v2010_v55 = vadd.f32 %v6398_v2, %v1919_v12  ;;  %v1921_v49 = vpop.f32.mrb[9].mxu1 }
 0x3fa   : > { %2147 = vst.msk [vmem:[%s6445_s11 + $0x38] sm:$0xff] %vm979_vm4, %v2130_v53  ;;  %v2011_v9 = vadd.f32 %v6398_v2, %v1921_v49  ;;  %v1923_v16 = vpop.f32.mrb[10].mxu1 }
 0x3fb   : > { %v2115_v20 = vadd.f32 %v2087_v37, %v2010_v55  ;;  %v2012_v25 = vadd.f32 %v6402_v30, %v1923_v16  ;;  %v1925_v29 = vpop.f32.mrb[11].mxu1  ;;  %v4903_v16 = vunpack.i.h.bf16 %v4901_v3 }
 0x3fc   : > { %v2116_v35 = vadd.f32 %v4873_v61, %v2011_v9  ;;  %v2013_v7 = vadd.f32 %v6402_v30, %v1925_v29  ;;  %v4896_v61 = vpop.permute.xlu0 %4895 }
 0x3fd   : > { %v2131_v21 = vmax.f32 %v2115_v20, 0.0  ;;  %v2117_v24 = vadd.f32 %v2088_v6, %v2012_v25  ;;  %v4898_v28 = vunpack.i.h.bf16 %v4896_v61  ;;  %v4897_v33 = vunpack.i.l.bf16 %v4896_v61 }
 0x3fe   : > { %v2132_v2 = vmax.f32 %v2116_v35, 0.0  ;;  %v2118_v36 = vadd.f32 %v4878_v60, %v2013_v7  ;;  %v4902_v6 = vunpack.i.l.bf16 %v4901_v3 }
 0x3ff   : > { %2148 = vst [vmem:[%s6445_s11 + $0x40] sm:$0xff] %v2131_v21  ;;  %v2133_v43 = vmax.f32 %v2117_v24, 0.0  ;;  %v3988_v53 = vsel %vm637_vm2, %v4897_v33, %v4898_v28 }
 0x400   : > { %2149 = vst.msk [vmem:[%s6445_s11 + $0x48] sm:$0xff] %vm979_vm4, %v2132_v2  ;;  %v2134_v44 = vmax.f32 %v2118_v36, 0.0  ;;  %v1929_v47 = vpop.f32.mrb[12].mxu1  ;;  %v4906_v49 = vpop.permute.xlu0 %4905  ;;  %v3989_v21 = vsel %vm637_vm2, %v4902_v6, %v4903_v16 }
 0x401   : > { %2150 = vst [vmem:[%s6445_s11 + $0x50] sm:$0xff] %v2133_v43  ;;  %v2014_v30 = vadd.f32 %v6407_v8, %v1929_v47  ;;  %v1931_v50 = vpop.f32.mrb[13].mxu1  ;;  %v4908_v32 = vunpack.i.h.bf16 %v4906_v49  ;;  %v4907_v35 = vunpack.i.l.bf16 %v4906_v49  ;;  %v4911_v2 = vpop.permute.xlu1 %4910 }
 0x402   : > { %2151 = vst.msk [vmem:[%s6445_s11 + $0x58] sm:$0xff] %vm979_vm4, %v2134_v44  ;;  %v2015_v52 = vadd.f32 %v6407_v8, %v1931_v50  ;;  %v1933_v63 = vpop.f32.mrb[14].mxu1 }
 0x403   : > { %v2119_v40 = vadd.f32 %v2089_v48, %v2014_v30  ;;  %v2016_v19 = vadd.f32 %v6409_v51, %v1933_v63  ;;  %v1935_v11 = vpop.f32.mrb[15].mxu1  ;;  %v3990_v46 = vsel %vm637_vm2, %v4907_v35, %v4908_v32  ;;  %v4912_v63 = vunpack.i.l.bf16 %v4911_v2 }
 0x404   : > { %v2120_v34 = vadd.f32 %v4883_v39, %v2015_v52  ;;  %v2017_v14 = vadd.f32 %v6409_v51, %v1935_v11  ;;  %v3987_v51 = vsel %vm637_vm2, %v4892_v27, %v4893_v62  ;;  %v4916_v48 = vpop.permute.xlu0 %4915  ;;  %v4913_v52 = vunpack.i.h.bf16 %v4911_v2 }
 0x405   : > { %v2135_v15 = vmax.f32 %v2119_v40, 0.0  ;;  %v2121_v54 = vadd.f32 %v2090_v38, %v2016_v19  ;;  %v4918_v11 = vunpack.i.h.bf16 %v4916_v48 }
 0x406   : > { %v2136_v42 = vmax.f32 %v2120_v34, 0.0  ;;  %v2122_v58 = vadd.f32 %v4888_v41, %v2017_v14  ;;  %v4917_v34 = vunpack.i.l.bf16 %v4916_v48 }
 0x407   : > { %2152 = vst [vmem:[%s6445_s11 + $0x60] sm:$0xff] %v2135_v15  ;;  %v2137_v59 = vmax.f32 %v2121_v54, 0.0 }
 0x408   : > { %2153 = vst.msk [vmem:[%s6445_s11 + $0x68] sm:$0xff] %vm979_vm4, %v2136_v42  ;;  %v2138_v8 = vmax.f32 %v2122_v58, 0.0  ;;  %v3991_v42 = vsel %vm637_vm2, %v4912_v63, %v4913_v52  ;;  %v3992_v61 = vsel %vm637_vm2, %v4917_v34, %v4918_v11  ;;  %v4926_v33 = vpop.permute.xlu0 %4925 }
 0x409   : > { %2154 = vst [vmem:[%s6445_s11 + $0x70] sm:$0xff] %v2137_v59  ;;  %v4921_v59 = vpop.permute.xlu1 %4920 }
 0x40a   : > { %2155 = vst.msk [vmem:[%s6445_s11 + $0x78] sm:$0xff] %vm979_vm4, %v2138_v8 }
 0x498   : > { %v3804_v57 = vpop.f32.mrb[16].mxu1 }
 0x499   : > { %v3907_v60 = vadd.f32 %v6428_v13, %v3804_v57  ;;  %v3806_v4 = vpop.f32.mrb[17].mxu1 }
 0x49a   : > { %v3908_v22 = vadd.f32 %v6428_v13, %v3806_v4  ;;  %v3808_v10 = vpop.f32.mrb[18].mxu1  ;;  %v4922_v4 = vunpack.i.l.bf16 %v4921_v59 }
 0x49b   : > { %v4011_v12 = vadd.f32 %v3987_v51, %v3907_v60  ;;  %v3909_v37 = vadd.f32 %v6430_v18, %v3808_v10  ;;  %v3810_v55 = vpop.f32.mrb[19].mxu1  ;;  %v4923_v60 = vunpack.i.h.bf16 %v4921_v59 }
 0x49c   : > { %v4012_v17 = vadd.f32 %v4893_v62, %v3908_v22  ;;  %v3910_v9 = vadd.f32 %v6430_v18, %v3810_v55 }
 0x49d   : > { %v4027_v20 = vmax.f32 %v4011_v12, 0.0  ;;  %v4013_v25 = vadd.f32 %v3988_v53, %v3909_v37  ;;  %v4928_v53 = vunpack.i.h.bf16 %v4926_v33  ;;  %v4927_v12 = vunpack.i.l.bf16 %v4926_v33 }
 0x49e   : > { %v4028_v13 = vmax.f32 %v4012_v17, 0.0  ;;  %v4014_v29 = vadd.f32 %v4898_v28, %v3910_v9  ;;  %v3993_v17 = vsel %vm637_vm2, %v4922_v4, %v4923_v60 }
 0x49f   : > { %4472 = vst [vmem:[%s6445_s11 + $0x80] sm:$0xff] %v4027_v20  ;;  %v4029_v7 = vmax.f32 %v4013_v25, 0.0  ;;  %v3994_v20 = vsel %vm637_vm2, %v4927_v12, %v4928_v53 }
 0x4a0   : > { %4473 = vst.msk [vmem:[%s6445_s11 + $0x88] sm:$0xff] %vm979_vm4, %v4028_v13  ;;  %v4030_v39 = vmax.f32 %v4014_v29, 0.0  ;;  %v3814_v5 = vpop.f32.mrb[20].mxu1 }
 0x4a1   : > { %4474 = vst [vmem:[%s6445_s11 + $0x90] sm:$0xff] %v4029_v7  ;;  %v3911_v18 = vadd.f32 %v6434_v26, %v3814_v5  ;;  %v3816_v24 = vpop.f32.mrb[21].mxu1 }
 0x4a2   : > { %4475 = vst.msk [vmem:[%s6445_s11 + $0x98] sm:$0xff] %vm979_vm4, %v4030_v39  ;;  %v3912_v36 = vadd.f32 %v6434_v26, %v3816_v24  ;;  %v3818_v41 = vpop.f32.mrb[22].mxu1 }
 0x4a3   : > { %v4015_v43 = vadd.f32 %v3989_v21, %v3911_v18  ;;  %v3913_v44 = vadd.f32 %v6439_v45, %v3818_v41  ;;  %v3820_v47 = vpop.f32.mrb[23].mxu1 }
 0x4a4   : > { %v4016_v30 = vadd.f32 %v4903_v16, %v3912_v36  ;;  %v3914_v50 = vadd.f32 %v6439_v45, %v3820_v47 }
 0x4a5   : > { %v4031_v38 = vmax.f32 %v4015_v43, 0.0  ;;  %v4017_v40 = vadd.f32 %v3990_v46, %v3913_v44 }
 0x4a6   : > { %v4032_v26 = vmax.f32 %v4016_v30, 0.0  ;;  %v4018_v19 = vadd.f32 %v4908_v32, %v3914_v50 }
 0x4a7   : > { %4476 = vst [vmem:[%s6445_s11 + $0xa0] sm:$0xff] %v4031_v38  ;;  %v4033_v14 = vmax.f32 %v4017_v40, 0.0 }
 0x4a8   : > { %4477 = vst.msk [vmem:[%s6445_s11 + $0xa8] sm:$0xff] %vm979_vm4, %v4032_v26  ;;  %v4034_v15 = vmax.f32 %v4018_v19, 0.0  ;;  %v3824_v54 = vpop.f32.mrb[24].mxu1 }
 0x4a9   : > { %4478 = vst [vmem:[%s6445_s11 + $0xb0] sm:$0xff] %v4033_v14  ;;  %v3915_v45 = vadd.f32 %v6443_v0, %v3824_v54  ;;  %v3826_v58 = vpop.f32.mrb[25].mxu1 }
 0x4aa   : > { %4479 = vst.msk [vmem:[%s6445_s11 + $0xb8] sm:$0xff] %vm979_vm4, %v4034_v15  ;;  %v3916_v8 = vadd.f32 %v6443_v0, %v3826_v58  ;;  %v3828_v23 = vpop.f32.mrb[26].mxu1 }
 0x4ab   : > { %v4019_v62 = vadd.f32 %v3991_v42, %v3915_v45  ;;  %v3917_v27 = vadd.f32 %v6451_v56, %v3828_v23  ;;  %v3830_v28 = vpop.f32.mrb[27].mxu1 }
 0x4ac   : > { %v4020_v57 = vadd.f32 %v4913_v52, %v3916_v8  ;;  %v3918_v51 = vadd.f32 %v6451_v56, %v3830_v28 }
 0x4ad   : > { %v4035_v3 = vmax.f32 %v4019_v62, 0.0  ;;  %v4021_v22 = vadd.f32 %v3992_v61, %v3917_v27 }
 0x4ae   : > { %v4036_v0 = vmax.f32 %v4020_v57, 0.0  ;;  %v4022_v10 = vadd.f32 %v4918_v11, %v3918_v51 }
 0x4af   : > { %4480 = vst [vmem:[%s6445_s11 + $0xc0] sm:$0xff] %v4035_v3  ;;  %v4037_v37 = vmax.f32 %v4021_v22, 0.0 }
 0x4b0   : > { %4481 = vst.msk [vmem:[%s6445_s11 + $0xc8] sm:$0xff] %vm979_vm4, %v4036_v0  ;;  %v4038_v55 = vmax.f32 %v4022_v10, 0.0  ;;  %v3834_v49 = vpop.f32.mrb[28].mxu1 }
 0x4b1   : > { %4482 = vst [vmem:[%s6445_s11 + $0xd0] sm:$0xff] %v4037_v37  ;;  %v3919_v56 = vadd.f32 %v6463_v1, %v3834_v49  ;;  %v3836_v9 = vpop.f32.mrb[29].mxu1 }
 0x4b2   : > { %4483 = vst.msk [vmem:[%s6445_s11 + $0xd8] sm:$0xff] %vm979_vm4, %v4038_v55  ;;  %v3920_v16 = vadd.f32 %v6463_v1, %v3836_v9  ;;  %v3838_v6 = vpop.f32.mrb[30].mxu1 }
 0x4b3   : > { %v4023_v25 = vadd.f32 %v3993_v17, %v3919_v56  ;;  %v3921_v13 = vadd.f32 %v6467_v31, %v3838_v6  ;;  %v3840_v29 = vpop.f32.mrb[31].mxu1 }
 0x4b4   : > { %v4024_v32 = vadd.f32 %v4923_v60, %v3920_v16  ;;  %v3922_v35 = vadd.f32 %v6467_v31, %v3840_v29 }
 0x4b5   : > { %v4039_v7 = vmax.f32 %v4023_v25, 0.0  ;;  %v4025_v39 = vadd.f32 %v3994_v20, %v3921_v13 }
 0x4b6   : > { %v4040_v1 = vmax.f32 %v4024_v32, 0.0  ;;  %v4026_v5 = vadd.f32 %v4928_v53, %v3922_v35 }
 0x4b7   : > { %4484 = vst [vmem:[%s6445_s11 + $0xe0] sm:$0xff] %v4039_v7  ;;  %v4041_v21 = vmax.f32 %v4025_v39, 0.0 }
 0x4b8   : > { %4485 = vst.msk [vmem:[%s6445_s11 + $0xe8] sm:$0xff] %vm979_vm4, %v4040_v1  ;;  %v4042_v31 = vmax.f32 %v4026_v5, 0.0 }
 0x4b9   : > { %4486 = vst [vmem:[%s6445_s11 + $0xf0] sm:$0xff] %v4041_v21 }
 0x4ba   : > { %4487 = vst.msk [vmem:[%s6445_s11 + $0xf8] sm:$0xff] %vm979_vm4, %v4042_v31 }
 0x4bb   : > { %5062 = shalt.err (!%p5059_p3)
}
 0x4bc   : > { %s5063_s13 = scalar_lea.hbm %s6547_s16, 4096  ;;  %s5067_s6 = scalar_lea.hbm %s6604_s5, 8192 }
 0x4bd   : > { %p5064_p4 = scmp.ne.s32.totalorder %s6547_s16, %s5063_s13  ;;  %p5068_p9 = scmp.lt.u32.totalorder %s6547_s16, %s6604_s5 }
 0x4be   : > { %p5069_p10 = scmp.lt.u32.totalorder %s5067_s6, %s5063_s13  ;;  %p5071_p12 = scmp.lt.u32.totalorder %s5063_s13, %s6547_s16 }
 0x4bf   : > { %p5065_p7 = pnand %p5064_p4, %p5189_p5 }
 0x4c0   : > { %p5070_p11 = por %p5069_p10, %p5068_p9 }
 0x4c1   : > { %p5066_p8 = pneg %p5065_p7 }
 0x4c2   : > { %p5072_p13 = por %p5071_p12, %p5070_p11 }
 0x4c4   : > { %p5073_p0 = pnand %p5072_p13, %p5066_p8 }
 0x4c6   : > { %5076 = shalt.err (!%p5073_p0)
}
 0x4c7   : > { %s5119_s11 = smov 256   ;;  %s5120_s8 = smov 16  }
 0x4c8   : > { %4801 = dma.vmem_to_hbm [thread:$0]  (%p5189_p5), %s6549_s12, 4096, %s6547_s16, %s6558_s22, %s5119_s11, %s5119_s11, %s5120_s8  }
 0x4c9 PF: > { %p4807_p1 = scmp.ge.s32.totalorder %s5111_s21, 2  ;;  %s4090_s14 = sand.u32 1, %s5099_s18  }
 0x4ca   : > { %s4091_s15 = scalar_lea.sflag [#allocation4], %s4090_s14 }
 0x4cb   : > { %p4804_p2 = pnand %p4807_p1, %p5193_p6 }
 0x4cd   : > { %5094 = dma.done.wait (!%p4804_p2), %s4091_s15, 4096  }
 0x4ce   : > { %5096 = vsyncadd (!%p4804_p2), %s4091_s15, 4294963200  ;;  %p15_p3 = scmp.ge.s32.totalorder %s5176_s24, 4   ;;  %s6611_s18 = smov %s5103_s19 }
 0x4cf   : > { %s6612_s19 = smov %s5107_s20  ;;  %s6613_s20 = smov %s5187_s27 }
 0x4d0   : > { %s6614_s21 = smov %s5176_s24  ;;  %17 = sbr.rel (!%p15_p3) target bundleno = 3 (0x3), region = 85 }
 0x4d7   :  { %4096 = vsyncpa [#allocation4], 1 }
 0x4d8   :  { %4098 = vsyncpa [#allocation4 + $0x1], 1 }

</bundles_post_ra>
